<compile_context>
chip_gen: v5e
topology: v5e:2x2
jax: 0.10.0
libtpu: 0.0.40
codegen_flags: <defaults>
</compile_context>

<pallas_src>
import functools
import math

import jax
import jax.numpy as jnp
from jax import lax
from jax.experimental import pallas as pl
from jax.experimental.pallas import tpu as pltpu


def memory_module_kernel(
    qm_ref,      # (TB, 4D)  [q | m | q | m], compute dtype (f32 or bf16)
    mq_ref,      # (TB, 2D)  [m | q],          compute dtype
    facts_ref,   # (TB, L, D)                  compute dtype
    nf_ref,      # (TB, 1)   int32
    w1_ref,      # (4D, A)   compute dtype (original W1, stored (in, out))
    w1b_ref,     # (1, A)    f32
    w2v_ref,     # (1, A)    f32   (W2 weight as a row vector)
    w2b_ref,     # (1, 1)    f32
    wf_ref,      # (D, 2H)   [Wr | W],  compute dtype
    uu_ref,      # (H, 2H)   [Ur | U],  compute dtype
    ub_ref,      # (1, 2H)   [ur_b | u_b], f32
    wtmq_ref,    # (2D, D)   Wt rows for [m | q], compute dtype
    wtc_ref,     # (H, D)    Wt rows for c,       compute dtype
    wtb_ref,     # (1, D)    f32
    out_ref,     # (TB, D)   f32
    *,
    approx_recip: bool,
):
    facts = facts_ref[...]                     # (TB, L, D)
    qm = qm_ref[...]                           # (TB, 4D)
    mq = mq_ref[...]                           # (TB, 2D)
    nf = nf_ref[...]                           # (TB, 1) int32

    TB, L, D = facts.shape
    H = uu_ref.shape[0]
    cdt = facts.dtype                          # MXU operand dtype (f32 or bf16)

    def dg(x, w):                              # (TB, L, K) @ (K, N) -> (TB, L, N) f32
        return lax.dot_general(
            x, w, dimension_numbers=(((2,), (0,)), ((), ())),
            preferred_element_type=jnp.float32)

    # ---- attention MLP: one fused K=4D lane-dense contraction against the original
    #      (4D, A) W1 (full 128-row MXU fill) instead of four K=D partial matmuls ----
    facts4 = jnp.concatenate([facts, facts, facts, facts], axis=-1)   # (TB, L, 4D)
    qm_b = qm[:, None, :]                                             # (TB, 1, 4D)
    z_prod = facts4 * qm_b                       # lanes [0, 2D):  f*q | f*m
    z_diff = jnp.abs(facts4 - qm_b)              # lanes [2D, 4D): |f-q| | |f-m|
    lane = lax.broadcasted_iota(jnp.int32, (TB, L, 4 * D), 2)
    z = jnp.where(lane < 2 * D, z_prod, z_diff)  # matches torch's cat order exactly

    h1 = jnp.tanh(dg(z, w1_ref[...]) + w1b_ref[...])                  # (TB, L, A) f32
    # W2 (N=1 projection) as a lane reduction instead of a degenerate matmul.
    Z = jnp.sum(h1 * w2v_ref[...][None, :, :], axis=-1) + w2b_ref[...]  # (TB, L) f32

    # ---- length mask + softmax over facts axis.
    # NOTE: finite -1e30 sentinel (torch uses -inf): rows with num_facts == 0 produce
    # uniform attention and c == 0 here instead of the reference's NaN.
    pos = lax.broadcasted_iota(jnp.int32, (TB, L), 1)
    Zm = jnp.where(pos < nf, Z, jnp.float32(-1e30))
    e = jnp.exp(Zm - jnp.max(Zm, axis=1, keepdims=True))
    denom = jnp.sum(e, axis=1, keepdims=True)
    if approx_recip:
        g = e * pl.reciprocal(denom, approx=True)   # EUP slot; off the VALU
    else:
        g = e / denom                               # exact path for the 1e-4 f32 check

    # ---- attention GRU (fact projections hoisted out of the serial loop) ----
    fp = dg(facts, wf_ref[...])                 # (TB, L, 2H): [Wr(fact) | W(fact)]
    fpr, fpc = fp[..., :H], fp[..., H:]
    uu = uu_ref[...]                            # (H, 2H)
    ub = ub_ref[...]                            # (1, 2H)
    g_b = jnp.broadcast_to(g[:, :, None], (TB, L, H))   # one relayout outside the loop

    h = mq[:, :D].astype(jnp.float32)           # h0 = m_old (requires agru_dim == rep_dim)
    c = jnp.zeros((TB, H), jnp.float32)
    last = nf - 1
    # Static unroll: L is small. TODO(synk): lax.fori_loop(..., unroll=True) if L grows.
    for i in range(L):
        hu = jnp.dot(h.astype(cdt), uu, preferred_element_type=jnp.float32) + ub
        r = jax.nn.sigmoid(fpr[:, i, :] + hu[:, :H])
        h_t = jnp.tanh(fpc[:, i, :] + r * hu[:, H:])
        gi = g_b[:, i, :]
        h = gi * h_t + (1.0 - gi) * h
        c = jnp.where(last == i, h, c)          # keep hidden state at step nf-1

    # ---- output projection relu(Wt([m, c, q])): Wt split, no in-kernel concat ----
    out = jnp.maximum(
        jnp.dot(mq, wtmq_ref[...], preferred_element_type=jnp.float32)
        + jnp.dot(c.astype(cdt), wtc_ref[...], preferred_element_type=jnp.float32)
        + wtb_ref[...],
        0.0,
    )
    # TODO(synk): lane-dense writeback (fold 128//D batch rows into the lane axis) —
    # modest store-tail win at D<128; pure layout plumbing.
    out_ref[...] = out.astype(out_ref.dtype)


def pack_weights(params, *, precision="f32"):
    """Host-side weight repacking. Call ONCE and cache / close over across forward calls."""
    cdt = jnp.bfloat16 if precision == "bf16" else jnp.float32
    D = params["wr_w"].shape[0]
    A = params["w1_w"].shape[1]
    H = params["ur_w"].shape[0]
    wt = params["wt_w"]                                   # (2D+H, D), input order [m, c, q]
    return dict(
        precision=precision, D=D, A=A, H=H,
        w1=params["w1_w"].astype(cdt),                    # (4D, A) kept whole (fused matmul)
        w1_b=params["w1_b"].astype(jnp.float32),
        w2v=params["w2_w"].T.astype(jnp.float32),         # (1, A)
        w2b=params["w2_b"].astype(jnp.float32),
        wf=jnp.concatenate([params["wr_w"], params["w_w"]], axis=1).astype(cdt),   # (D, 2H)
        uu=jnp.concatenate([params["ur_w"], params["u_w"]], axis=1).astype(cdt),   # (H, 2H)
        ub=jnp.concatenate([params["ur_b"], params["u_b"]], axis=1).astype(jnp.float32),
        wt_mq=jnp.concatenate([wt[:D], wt[D + H:]], axis=0).astype(cdt),           # (2D, D)
        wt_c=wt[D:D + H].astype(cdt),                                              # (H, D)
        wt_b=params["wt_b"].astype(jnp.float32),
    )


def _pick_batch_tile(B):
    """Batch tile: large enough to amortize per-grid-step overhead / feed the serial GRU
    matmuls with useful rows, small enough for >=2 grid steps (v7x has 2 TensorCores)
    and a ~<40 MiB VMEM working set (v7x has only 64 MiB physical VMEM)."""
    TB_CAP = 1024            # sweep {512, 1024, 2048, 4096} at production batch sizes
    if B <= 256:
        return B             # single step; blocks equal full array dims (no padding)
    return min(TB_CAP, max(256, (pl.cdiv(B, 2) // 8) * 8))


def memory_module_forward(queries, facts, num_facts, m_old, packed):
    """queries (B,1,D), facts (B,L,D), num_facts (B,) int, m_old (B,1,D) -> (B,1,D) f32."""
    B, L, D = facts.shape
    A, H = packed["A"], packed["H"]
    if H != D:
        raise ValueError(f"MemoryModule kernel requires agru_dim == rep_dim (h0 = m_old); "
                         f"got agru_dim={H}, rep_dim={D}")
    cdt = jnp.bfloat16 if packed["precision"] == "bf16" else jnp.float32

    q2 = queries[:, 0, :]
    m2 = m_old[:, 0, :]
    qm4 = jnp.concatenate([q2, m2, q2, m2], axis=1).astype(cdt)   # (B, 4D) interaction row
    mq = jnp.concatenate([m2, q2], axis=1).astype(cdt)            # (B, 2D) for h0 / Wt
    facts_c = facts.astype(cdt)                                   # bf16 path halves facts DMA
    nf = num_facts.astype(jnp.int32).reshape(B, 1)

    TB = _pick_batch_tile(B)
    Bp = pl.cdiv(B, TB) * TB
    if Bp != B:
        pad = Bp - B
        qm4 = jnp.pad(qm4, ((0, pad), (0, 0)))
        mq = jnp.pad(mq, ((0, pad), (0, 0)))
        facts_c = jnp.pad(facts_c, ((0, pad), (0, 0), (0, 0)))
        nf = jnp.pad(nf, ((0, pad), (0, 0)), constant_values=1)

    grid = (Bp // TB,)
    batched2 = lambda i: (i, 0)
    batched3 = lambda i: (i, 0, 0)
    resident = lambda i: (0, 0)
    # TODO(synk): add pipeline_mode=pl.Buffered(1) on the resident weight specs once
    # D/A/H reach production sizes (negligible VMEM win at 32).

    in_specs = [
        pl.BlockSpec((TB, 4 * D), batched2),       # [q|m|q|m]
        pl.BlockSpec((TB, 2 * D), batched2),       # [m|q]
        pl.BlockSpec((TB, L, D), batched3),        # facts
        pl.BlockSpec((TB, 1), batched2),           # num_facts
        pl.BlockSpec((4 * D, A), resident),        # W1 (fused)
        pl.BlockSpec((1, A), resident),            # b1
        pl.BlockSpec((1, A), resident),            # W2 row
        pl.BlockSpec((1, 1), resident),            # b2
        pl.BlockSpec((D, 2 * H), resident),        # [Wr | W]
        pl.BlockSpec((H, 2 * H), resident),        # [Ur | U]
        pl.BlockSpec((1, 2 * H), resident),        # [ur_b | u_b]
        pl.BlockSpec((2 * D, D), resident),        # Wt rows for [m|q]
        pl.BlockSpec((H, D), resident),            # Wt rows for c
        pl.BlockSpec((1, D), resident),            # wt_b
    ]

    kernel = functools.partial(memory_module_kernel,
                               approx_recip=(packed["precision"] == "bf16"))

    out = pl.pallas_call(
        kernel,
        out_shape=jax.ShapeDtypeStruct((Bp, D), jnp.float32),
        grid=grid,
        in_specs=in_specs,
        out_specs=pl.BlockSpec((TB, D), batched2),
        compiler_params=pltpu.CompilerParams(
            dimension_semantics=("parallel",),               # megacore / v7x dual-TC sharding
            vmem_limit_bytes=48 * 1024 * 1024,               # > 32 MiB default, < v7x's 64 MiB
        ),
    )(qm4, mq, facts_c, nf,
      packed["w1"], packed["w1_b"], packed["w2v"], packed["w2b"],
      packed["wf"], packed["uu"], packed["ub"],
      packed["wt_mq"], packed["wt_c"], packed["wt_b"])

    return out[:B][:, None, :]


# ----------------------------- reference & test harness -----------------------------

def _linear_init(key, in_dim, out_dim, bias=True):
    """PyTorch nn.Linear default init, weight stored transposed as (in_dim, out_dim)."""
    bound = 1.0 / math.sqrt(in_dim)
    kw, kb = jax.random.split(key)
    w = jax.random.uniform(kw, (in_dim, out_dim), jnp.float32, -bound, bound)
    b = jax.random.uniform(kb, (1, out_dim), jnp.float32, -bound, bound) if bias \
        else jnp.zeros((1, out_dim), jnp.float32)
    return w, b


def make_params(key, rep_dim, attention_dim, agru_dim):
    ks = jax.random.split(key, 7)
    w1_w, w1_b = _linear_init(ks[0], 4 * rep_dim, attention_dim)
    w2_w, w2_b = _linear_init(ks[1], attention_dim, 1)
    wr_w, _ = _linear_init(ks[2], rep_dim, agru_dim, bias=False)
    ur_w, ur_b = _linear_init(ks[3], agru_dim, agru_dim)
    w_w, _ = _linear_init(ks[4], rep_dim, agru_dim, bias=False)
    u_w, u_b = _linear_init(ks[5], agru_dim, agru_dim)
    wt_w, wt_b = _linear_init(ks[6], 2 * rep_dim + agru_dim, rep_dim)
    return dict(w1_w=w1_w, w1_b=w1_b, w2_w=w2_w, w2_b=w2_b,
                wr_w=wr_w, ur_w=ur_w, ur_b=ur_b,
                w_w=w_w, u_w=u_w, u_b=u_b,
                wt_w=wt_w, wt_b=wt_b)


def memory_module_ref(queries, facts, num_facts, m_old, params):
    """Pure-JAX reference mirroring the PyTorch forward."""
    B, L, D = facts.shape
    q = queries
    m = m_old
    z = jnp.concatenate(
        [facts * q, facts * m, jnp.abs(facts - q), jnp.abs(facts - m)], axis=2)
    Z = (jnp.tanh(z @ params["w1_w"] + params["w1_b"]) @ params["w2_w"]
         + params["w2_b"])[..., 0]
    mask = jnp.arange(L)[None, :] < num_facts[:, None]
    Zm = jnp.where(mask, Z, -jnp.inf)
    g = jax.nn.softmax(Zm, axis=1)
    h = m[:, 0, :]
    c = jnp.zeros_like(h)
    for i in range(L):
        fact = facts[:, i, :]
        gi = g[:, i:i + 1]
        r = jax.nn.sigmoid(fact @ params["wr_w"] + h @ params["ur_w"] + params["ur_b"])
        h_t = jnp.tanh(fact @ params["w_w"] + r * (h @ params["u_w"] + params["u_b"]))
        h = gi * h_t + (1.0 - gi) * h
        c = jnp.where((num_facts[:, None] - 1) == i, h, c)
    cat = jnp.concatenate([m[:, 0, :], c, q[:, 0, :]], axis=1)
    out = jnp.maximum(cat @ params["wt_w"] + params["wt_b"], 0.0)
    return out[:, None, :]


if __name__ == "__main__":
    rep_dim, attention_dim, agru_dim = 32, 32, 32   # agru_dim == rep_dim (module requires it)
    key = jax.random.PRNGKey(0)
    k_q, k_f, k_m, k_p, k_q2, k_f2, k_m2, k_n2 = jax.random.split(key, 8)
    params = make_params(k_p, rep_dim, attention_dim, agru_dim)

    # --- case 1: tiny batch, exact f32 path, 1e-4 vs reference ---
    B, L = 2, 8
    queries = jax.random.normal(k_q, (B, 1, rep_dim), jnp.float32)
    facts = jax.random.normal(k_f, (B, L, rep_dim), jnp.float32)
    m_old = jax.random.normal(k_m, (B, 1, rep_dim), jnp.float32)
    num_facts = jnp.array([5, 8], dtype=jnp.int32)

    packed_f32 = pack_weights(params, precision="f32")   # cached across calls
    out = jax.block_until_ready(
        memory_module_forward(queries, facts, num_facts, m_old, packed_f32))
    ref = memory_module_ref(queries, facts, num_facts, m_old, params)
    assert out.shape == (B, 1, rep_dim)
    assert jnp.allclose(out, ref, atol=1e-4, rtol=1e-4), "f32 mismatch vs reference"

    # --- case 2: batch > tile cap, exercises padding + 2-step parallel grid ---
    B2 = 300
    queries2 = jax.random.normal(k_q2, (B2, 1, rep_dim), jnp.float32)
    facts2 = jax.random.normal(k_f2, (B2, L, rep_dim), jnp.float32)
    m_old2 = jax.random.normal(k_m2, (B2, 1, rep_dim), jnp.float32)
    num_facts2 = jax.random.randint(k_n2, (B2,), 1, L + 1).astype(jnp.int32)
    out2 = jax.block_until_ready(
        memory_module_forward(queries2, facts2, num_facts2, m_old2, packed_f32))
    ref2 = memory_module_ref(queries2, facts2, num_facts2, m_old2, params)
    assert out2.shape == (B2, 1, rep_dim)
    assert jnp.allclose(out2, ref2, atol=1e-4, rtol=1e-4), "tiled f32 mismatch vs reference"

    # --- case 3: bf16 MXU path (production precision on v6e/v7x) — loose sanity bound ---
    packed_bf16 = pack_weights(params, precision="bf16")
    out_bf = jax.block_until_ready(
        memory_module_forward(queries, facts, num_facts, m_old, packed_bf16))
    assert bool(jnp.all(jnp.isfinite(out_bf)))
    assert float(jnp.max(jnp.abs(out_bf - ref))) < 0.2, "bf16 path diverged from reference"

    print("KERNEL_OK")
</pallas_src>

<mosaic_0001>
module attributes {stable_mosaic.version = 11 : i64} {
  func.func @memory_module_kernel(%arg0: i32, %arg1: memref<2x128xf32, #tpu.memory_space<vmem>>, %arg2: memref<2x64xf32, #tpu.memory_space<vmem>>, %arg3: memref<2x8x32xf32, #tpu.memory_space<vmem>>, %arg4: memref<2x1xi32, #tpu.memory_space<vmem>>, %arg5: memref<128x32xf32, #tpu.memory_space<vmem>>, %arg6: memref<1x32xf32, #tpu.memory_space<vmem>>, %arg7: memref<1x32xf32, #tpu.memory_space<vmem>>, %arg8: memref<1x1xf32, #tpu.memory_space<vmem>>, %arg9: memref<32x64xf32, #tpu.memory_space<vmem>>, %arg10: memref<32x64xf32, #tpu.memory_space<vmem>>, %arg11: memref<1x64xf32, #tpu.memory_space<vmem>>, %arg12: memref<64x32xf32, #tpu.memory_space<vmem>>, %arg13: memref<32x32xf32, #tpu.memory_space<vmem>>, %arg14: memref<1x32xf32, #tpu.memory_space<vmem>>, %arg15: memref<2x32xf32, #tpu.memory_space<vmem>>) attributes {dimension_semantics = [#tpu.dimension_semantics<parallel>], iteration_bounds = array<i64: 1>, scalar_prefetch = 0 : i64, scratch_operands = 0 : i64, tpu.core_type = #tpu.core_type<tc>, window_params = [{transform_indices = @transform_0, window_bounds = array<i64: 2, 128>}, {transform_indices = @transform_1, window_bounds = array<i64: 2, 64>}, {transform_indices = @transform_2, window_bounds = array<i64: 2, 8, 32>}, {transform_indices = @transform_3, window_bounds = array<i64: 2, 1>}, {pipeline_mode = #tpu.pipeline_mode<synchronous>, transform_indices = @transform_4, window_bounds = array<i64: 128, 32>}, {pipeline_mode = #tpu.pipeline_mode<synchronous>, transform_indices = @transform_5, window_bounds = array<i64: 1, 32>}, {pipeline_mode = #tpu.pipeline_mode<synchronous>, transform_indices = @transform_6, window_bounds = array<i64: 1, 32>}, {pipeline_mode = #tpu.pipeline_mode<synchronous>, transform_indices = @transform_7, window_bounds = array<i64: 1, 1>}, {pipeline_mode = #tpu.pipeline_mode<synchronous>, transform_indices = @transform_8, window_bounds = array<i64: 32, 64>}, {pipeline_mode = #tpu.pipeline_mode<synchronous>, transform_indices = @transform_9, window_bounds = array<i64: 32, 64>}, {pipeline_mode = #tpu.pipeline_mode<synchronous>, transform_indices = @transform_10, window_bounds = array<i64: 1, 64>}, {pipeline_mode = #tpu.pipeline_mode<synchronous>, transform_indices = @transform_11, window_bounds = array<i64: 64, 32>}, {pipeline_mode = #tpu.pipeline_mode<synchronous>, transform_indices = @transform_12, window_bounds = array<i64: 32, 32>}, {pipeline_mode = #tpu.pipeline_mode<synchronous>, transform_indices = @transform_13, window_bounds = array<i64: 1, 32>}, {transform_indices = @transform_14, window_bounds = array<i64: 2, 32>}]} {
    %c0 = arith.constant 0 : index
    %c0_0 = arith.constant 0 : index
    %c0_1 = arith.constant 0 : index
    %0 = vector.load %arg3[%c0, %c0_0, %c0_1] : memref<2x8x32xf32, #tpu.memory_space<vmem>>, vector<2x8x32xf32>
    %c0_2 = arith.constant 0 : index
    %c0_3 = arith.constant 0 : index
    %1 = vector.load %arg1[%c0_2, %c0_3] : memref<2x128xf32, #tpu.memory_space<vmem>>, vector<2x128xf32>
    %c0_4 = arith.constant 0 : index
    %c0_5 = arith.constant 0 : index
    %2 = vector.load %arg2[%c0_4, %c0_5] : memref<2x64xf32, #tpu.memory_space<vmem>>, vector<2x64xf32>
    %c0_6 = arith.constant 0 : index
    %c0_7 = arith.constant 0 : index
    %3 = vector.load %arg4[%c0_6, %c0_7] : memref<2x1xi32, #tpu.memory_space<vmem>>, vector<2x1xi32>
    %4 = tpu.concatenate %0, %0, %0, %0 in 2 : vector<2x8x32xf32>, vector<2x8x32xf32>, vector<2x8x32xf32>, vector<2x8x32xf32> -> vector<2x8x128xf32>
    %5 = vector.shape_cast %1 : vector<2x128xf32> to vector<2x1x128xf32>
    %6 = vector.broadcast %5 : vector<2x1x128xf32> to vector<2x8x128xf32>
    %7 = arith.mulf %4, %6 : vector<2x8x128xf32>
    %8 = vector.broadcast %5 : vector<2x1x128xf32> to vector<2x8x128xf32>
    %9 = arith.subf %4, %8 : vector<2x8x128xf32>
    %10 = math.absf %9 : vector<2x8x128xf32>
    %11 = tpu.iota {dimensions = array<i32: 2>} : vector<2x8x128xi32>
    %c64_i32 = arith.constant 64 : i32
    %12 = vector.broadcast %c64_i32 : i32 to vector<2x8x128xi32>
    %13 = arith.cmpi slt, %11, %12 : vector<2x8x128xi32>
    %14 = arith.select %13, %7, %10 : vector<2x8x128xi1>, vector<2x8x128xf32>
    %c0_8 = arith.constant 0 : index
    %c0_9 = arith.constant 0 : index
    %15 = vector.load %arg5[%c0_8, %c0_9] : memref<128x32xf32, #tpu.memory_space<vmem>>, vector<128x32xf32>
    %cst = arith.constant dense<0.000000e+00> : vector<2x8x32xf32>
    %16 = tpu.matmul %14, %15, %cst {dimension_numbers = #tpu.dot_dimension_numbers<[2], [0], [0, 1], [1], [0, 0, 0, 1, 1, 1], [], []>} : vector<2x8x128xf32>, vector<128x32xf32>, vector<2x8x32xf32> -> vector<2x8x32xf32>
    %c0_10 = arith.constant 0 : index
    %c0_11 = arith.constant 0 : index
    %17 = vector.load %arg6[%c0_10, %c0_11] : memref<1x32xf32, #tpu.memory_space<vmem>>, vector<1x32xf32>
    %18 = vector.shape_cast %17 : vector<1x32xf32> to vector<1x1x32xf32>
    %19 = vector.broadcast %18 : vector<1x1x32xf32> to vector<2x8x32xf32>
    %20 = arith.addf %16, %19 : vector<2x8x32xf32>
    %21 = math.tanh %20 : vector<2x8x32xf32>
    %c0_12 = arith.constant 0 : index
    %c0_13 = arith.constant 0 : index
    %22 = vector.load %arg7[%c0_12, %c0_13] : memref<1x32xf32, #tpu.memory_space<vmem>>, vector<1x32xf32>
    %23 = vector.shape_cast %22 : vector<1x32xf32> to vector<1x1x32xf32>
    %24 = vector.broadcast %23 : vector<1x1x32xf32> to vector<2x8x32xf32>
    %25 = arith.mulf %21, %24 : vector<2x8x32xf32>
    %cst_14 = arith.constant dense<0.000000e+00> : vector<2x8xf32>
    %26 = vector.multi_reduction <add>, %25, %cst_14 [2] : vector<2x8x32xf32> to vector<2x8xf32>
    %c0_15 = arith.constant 0 : index
    %c0_16 = arith.constant 0 : index
    %27 = vector.load %arg8[%c0_15, %c0_16] : memref<1x1xf32, #tpu.memory_space<vmem>>, vector<1x1xf32>
    %28 = vector.broadcast %27 : vector<1x1xf32> to vector<2x8xf32>
    %29 = arith.addf %26, %28 : vector<2x8xf32>
    %30 = tpu.iota {dimensions = array<i32: 1>} : vector<2x8xi32>
    %31 = vector.broadcast %3 : vector<2x1xi32> to vector<2x8xi32>
    %32 = arith.cmpi slt, %30, %31 : vector<2x8xi32>
    %cst_17 = arith.constant -1.000000e+30 : f32
    %33 = vector.broadcast %cst_17 : f32 to vector<2x8xf32>
    %34 = arith.select %32, %29, %33 : vector<2x8xi1>, vector<2x8xf32>
    %cst_18 = arith.constant dense<0xFF800000> : vector<2xf32>
    %35 = vector.multi_reduction <maximumf>, %34, %cst_18 [1] : vector<2x8xf32> to vector<2xf32>
    %36 = vector.shape_cast %35 : vector<2xf32> to vector<2x1xf32>
    %37 = vector.broadcast %36 : vector<2x1xf32> to vector<2x8xf32>
    %38 = arith.subf %34, %37 : vector<2x8xf32>
    %39 = math.exp %38 : vector<2x8xf32>
    %cst_19 = arith.constant dense<0.000000e+00> : vector<2xf32>
    %40 = vector.multi_reduction <add>, %39, %cst_19 [1] : vector<2x8xf32> to vector<2xf32>
    %41 = vector.shape_cast %40 : vector<2xf32> to vector<2x1xf32>
    %42 = vector.broadcast %41 : vector<2x1xf32> to vector<2x8xf32>
    %43 = arith.divf %39, %42 : vector<2x8xf32>
    %c0_20 = arith.constant 0 : index
    %c0_21 = arith.constant 0 : index
    %44 = vector.load %arg9[%c0_20, %c0_21] : memref<32x64xf32, #tpu.memory_space<vmem>>, vector<32x64xf32>
    %cst_22 = arith.constant dense<0.000000e+00> : vector<2x8x64xf32>
    %45 = tpu.matmul %0, %44, %cst_22 {dimension_numbers = #tpu.dot_dimension_numbers<[2], [0], [0, 1], [1], [0, 0, 0, 1, 1, 1], [], []>} : vector<2x8x32xf32>, vector<32x64xf32>, vector<2x8x64xf32> -> vector<2x8x64xf32>
    %46 = vector.extract_strided_slice %45 {offsets = [0, 0, 0], sizes = [2, 8, 32], strides = [1, 1, 1]} : vector<2x8x64xf32> to vector<2x8x32xf32>
    %47 = vector.extract_strided_slice %45 {offsets = [0, 0, 32], sizes = [2, 8, 32], strides = [1, 1, 1]} : vector<2x8x64xf32> to vector<2x8x32xf32>
    %c0_23 = arith.constant 0 : index
    %c0_24 = arith.constant 0 : index
    %48 = vector.load %arg10[%c0_23, %c0_24] : memref<32x64xf32, #tpu.memory_space<vmem>>, vector<32x64xf32>
    %c0_25 = arith.constant 0 : index
    %c0_26 = arith.constant 0 : index
    %49 = vector.load %arg11[%c0_25, %c0_26] : memref<1x64xf32, #tpu.memory_space<vmem>>, vector<1x64xf32>
    %50 = vector.shape_cast %43 : vector<2x8xf32> to vector<2x8x1xf32>
    %51 = vector.shape_cast %50 : vector<2x8x1xf32> to vector<2x8x1xf32>
    %52 = vector.broadcast %51 : vector<2x8x1xf32> to vector<2x8x32xf32>
    %53 = vector.extract_strided_slice %2 {offsets = [0, 0], sizes = [2, 32], strides = [1, 1]} : vector<2x64xf32> to vector<2x32xf32>
    %cst_27 = arith.constant 0.000000e+00 : f32
    %54 = vector.broadcast %cst_27 : f32 to vector<2x32xf32>
    %c1_i32 = arith.constant 1 : i32
    %55 = vector.broadcast %c1_i32 : i32 to vector<2x1xi32>
    %56 = arith.subi %3, %55 : vector<2x1xi32>
    %cst_28 = arith.constant dense<0.000000e+00> : vector<2x64xf32>
    %57 = tpu.matmul %53, %48, %cst_28 {dimension_numbers = #tpu.dot_dimension_numbers<[1], [0], [0], [1], [0, 0, 1, 1], [], []>} : vector<2x32xf32>, vector<32x64xf32>, vector<2x64xf32> -> vector<2x64xf32>
    %58 = vector.broadcast %49 : vector<1x64xf32> to vector<2x64xf32>
    %59 = arith.addf %57, %58 : vector<2x64xf32>
    %60 = vector.extract_strided_slice %46 {offsets = [0, 0, 0], sizes = [2, 1, 32], strides = [1, 1, 1]} : vector<2x8x32xf32> to vector<2x1x32xf32>
    %61 = vector.shape_cast %60 : vector<2x1x32xf32> to vector<2x32xf32>
    %62 = vector.extract_strided_slice %59 {offsets = [0, 0], sizes = [2, 32], strides = [1, 1]} : vector<2x64xf32> to vector<2x32xf32>
    %63 = arith.addf %61, %62 : vector<2x32xf32>
    %64 = arith.negf %63 : vector<2x32xf32>
    %65 = math.exp %64 : vector<2x32xf32>
    %cst_29 = arith.constant 1.000000e+00 : f32
    %66 = vector.broadcast %cst_29 : f32 to vector<2x32xf32>
    %67 = arith.addf %66, %65 : vector<2x32xf32>
    %68 = arith.divf %66, %67 : vector<2x32xf32>
    %69 = vector.extract_strided_slice %47 {offsets = [0, 0, 0], sizes = [2, 1, 32], strides = [1, 1, 1]} : vector<2x8x32xf32> to vector<2x1x32xf32>
    %70 = vector.shape_cast %69 : vector<2x1x32xf32> to vector<2x32xf32>
    %71 = vector.extract_strided_slice %59 {offsets = [0, 32], sizes = [2, 32], strides = [1, 1]} : vector<2x64xf32> to vector<2x32xf32>
    %72 = arith.mulf %68, %71 : vector<2x32xf32>
    %73 = arith.addf %70, %72 : vector<2x32xf32>
    %74 = math.tanh %73 : vector<2x32xf32>
    %75 = vector.extract_strided_slice %52 {offsets = [0, 0, 0], sizes = [2, 1, 32], strides = [1, 1, 1]} : vector<2x8x32xf32> to vector<2x1x32xf32>
    %76 = vector.shape_cast %75 : vector<2x1x32xf32> to vector<2x32xf32>
    %77 = arith.mulf %76, %74 : vector<2x32xf32>
    %cst_30 = arith.constant 1.000000e+00 : f32
    %78 = vector.broadcast %cst_30 : f32 to vector<2x32xf32>
    %79 = arith.subf %78, %76 : vector<2x32xf32>
    %80 = arith.mulf %79, %53 : vector<2x32xf32>
    %81 = arith.addf %77, %80 : vector<2x32xf32>
    %c0_i32 = arith.constant 0 : i32
    %82 = vector.broadcast %c0_i32 : i32 to vector<2x1xi32>
    %83 = arith.cmpi eq, %56, %82 : vector<2x1xi32>
    %84 = vector.shape_cast %83 : vector<2x1xi1> to vector<2x1xi1>
    %85 = vector.broadcast %84 : vector<2x1xi1> to vector<2x32xi1>
    %86 = arith.select %85, %81, %54 : vector<2x32xi1>, vector<2x32xf32>
    %cst_31 = arith.constant dense<0.000000e+00> : vector<2x64xf32>
    %87 = tpu.matmul %81, %48, %cst_31 {dimension_numbers = #tpu.dot_dimension_numbers<[1], [0], [0], [1], [0, 0, 1, 1], [], []>} : vector<2x32xf32>, vector<32x64xf32>, vector<2x64xf32> -> vector<2x64xf32>
    %88 = vector.broadcast %49 : vector<1x64xf32> to vector<2x64xf32>
    %89 = arith.addf %87, %88 : vector<2x64xf32>
    %90 = vector.extract_strided_slice %46 {offsets = [0, 1, 0], sizes = [2, 1, 32], strides = [1, 1, 1]} : vector<2x8x32xf32> to vector<2x1x32xf32>
    %91 = vector.shape_cast %90 : vector<2x1x32xf32> to vector<2x32xf32>
    %92 = vector.extract_strided_slice %89 {offsets = [0, 0], sizes = [2, 32], strides = [1, 1]} : vector<2x64xf32> to vector<2x32xf32>
    %93 = arith.addf %91, %92 : vector<2x32xf32>
    %94 = arith.negf %93 : vector<2x32xf32>
    %95 = math.exp %94 : vector<2x32xf32>
    %cst_32 = arith.constant 1.000000e+00 : f32
    %96 = vector.broadcast %cst_32 : f32 to vector<2x32xf32>
    %97 = arith.addf %96, %95 : vector<2x32xf32>
    %98 = arith.divf %96, %97 : vector<2x32xf32>
    %99 = vector.extract_strided_slice %47 {offsets = [0, 1, 0], sizes = [2, 1, 32], strides = [1, 1, 1]} : vector<2x8x32xf32> to vector<2x1x32xf32>
    %100 = vector.shape_cast %99 : vector<2x1x32xf32> to vector<2x32xf32>
    %101 = vector.extract_strided_slice %89 {offsets = [0, 32], sizes = [2, 32], strides = [1, 1]} : vector<2x64xf32> to vector<2x32xf32>
    %102 = arith.mulf %98, %101 : vector<2x32xf32>
    %103 = arith.addf %100, %102 : vector<2x32xf32>
    %104 = math.tanh %103 : vector<2x32xf32>
    %105 = vector.extract_strided_slice %52 {offsets = [0, 1, 0], sizes = [2, 1, 32], strides = [1, 1, 1]} : vector<2x8x32xf32> to vector<2x1x32xf32>
    %106 = vector.shape_cast %105 : vector<2x1x32xf32> to vector<2x32xf32>
    %107 = arith.mulf %106, %104 : vector<2x32xf32>
    %cst_33 = arith.constant 1.000000e+00 : f32
    %108 = vector.broadcast %cst_33 : f32 to vector<2x32xf32>
    %109 = arith.subf %108, %106 : vector<2x32xf32>
    %110 = arith.mulf %109, %81 : vector<2x32xf32>
    %111 = arith.addf %107, %110 : vector<2x32xf32>
    %c1_i32_34 = arith.constant 1 : i32
    %112 = vector.broadcast %c1_i32_34 : i32 to vector<2x1xi32>
    %113 = arith.cmpi eq, %56, %112 : vector<2x1xi32>
    %114 = vector.shape_cast %113 : vector<2x1xi1> to vector<2x1xi1>
    %115 = vector.broadcast %114 : vector<2x1xi1> to vector<2x32xi1>
    %116 = arith.select %115, %111, %86 : vector<2x32xi1>, vector<2x32xf32>
    %cst_35 = arith.constant dense<0.000000e+00> : vector<2x64xf32>
    %117 = tpu.matmul %111, %48, %cst_35 {dimension_numbers = #tpu.dot_dimension_numbers<[1], [0], [0], [1], [0, 0, 1, 1], [], []>} : vector<2x32xf32>, vector<32x64xf32>, vector<2x64xf32> -> vector<2x64xf32>
    %118 = vector.broadcast %49 : vector<1x64xf32> to vector<2x64xf32>
    %119 = arith.addf %117, %118 : vector<2x64xf32>
    %120 = vector.extract_strided_slice %46 {offsets = [0, 2, 0], sizes = [2, 1, 32], strides = [1, 1, 1]} : vector<2x8x32xf32> to vector<2x1x32xf32>
    %121 = vector.shape_cast %120 : vector<2x1x32xf32> to vector<2x32xf32>
    %122 = vector.extract_strided_slice %119 {offsets = [0, 0], sizes = [2, 32], strides = [1, 1]} : vector<2x64xf32> to vector<2x32xf32>
    %123 = arith.addf %121, %122 : vector<2x32xf32>
    %124 = arith.negf %123 : vector<2x32xf32>
    %125 = math.exp %124 : vector<2x32xf32>
    %cst_36 = arith.constant 1.000000e+00 : f32
    %126 = vector.broadcast %cst_36 : f32 to vector<2x32xf32>
    %127 = arith.addf %126, %125 : vector<2x32xf32>
    %128 = arith.divf %126, %127 : vector<2x32xf32>
    %129 = vector.extract_strided_slice %47 {offsets = [0, 2, 0], sizes = [2, 1, 32], strides = [1, 1, 1]} : vector<2x8x32xf32> to vector<2x1x32xf32>
    %130 = vector.shape_cast %129 : vector<2x1x32xf32> to vector<2x32xf32>
    %131 = vector.extract_strided_slice %119 {offsets = [0, 32], sizes = [2, 32], strides = [1, 1]} : vector<2x64xf32> to vector<2x32xf32>
    %132 = arith.mulf %128, %131 : vector<2x32xf32>
    %133 = arith.addf %130, %132 : vector<2x32xf32>
    %134 = math.tanh %133 : vector<2x32xf32>
    %135 = vector.extract_strided_slice %52 {offsets = [0, 2, 0], sizes = [2, 1, 32], strides = [1, 1, 1]} : vector<2x8x32xf32> to vector<2x1x32xf32>
    %136 = vector.shape_cast %135 : vector<2x1x32xf32> to vector<2x32xf32>
    %137 = arith.mulf %136, %134 : vector<2x32xf32>
    %cst_37 = arith.constant 1.000000e+00 : f32
    %138 = vector.broadcast %cst_37 : f32 to vector<2x32xf32>
    %139 = arith.subf %138, %136 : vector<2x32xf32>
    %140 = arith.mulf %139, %111 : vector<2x32xf32>
    %141 = arith.addf %137, %140 : vector<2x32xf32>
    %c2_i32 = arith.constant 2 : i32
    %142 = vector.broadcast %c2_i32 : i32 to vector<2x1xi32>
    %143 = arith.cmpi eq, %56, %142 : vector<2x1xi32>
    %144 = vector.shape_cast %143 : vector<2x1xi1> to vector<2x1xi1>
    %145 = vector.broadcast %144 : vector<2x1xi1> to vector<2x32xi1>
    %146 = arith.select %145, %141, %116 : vector<2x32xi1>, vector<2x32xf32>
    %cst_38 = arith.constant dense<0.000000e+00> : vector<2x64xf32>
    %147 = tpu.matmul %141, %48, %cst_38 {dimension_numbers = #tpu.dot_dimension_numbers<[1], [0], [0], [1], [0, 0, 1, 1], [], []>} : vector<2x32xf32>, vector<32x64xf32>, vector<2x64xf32> -> vector<2x64xf32>
    %148 = vector.broadcast %49 : vector<1x64xf32> to vector<2x64xf32>
    %149 = arith.addf %147, %148 : vector<2x64xf32>
    %150 = vector.extract_strided_slice %46 {offsets = [0, 3, 0], sizes = [2, 1, 32], strides = [1, 1, 1]} : vector<2x8x32xf32> to vector<2x1x32xf32>
    %151 = vector.shape_cast %150 : vector<2x1x32xf32> to vector<2x32xf32>
    %152 = vector.extract_strided_slice %149 {offsets = [0, 0], sizes = [2, 32], strides = [1, 1]} : vector<2x64xf32> to vector<2x32xf32>
    %153 = arith.addf %151, %152 : vector<2x32xf32>
    %154 = arith.negf %153 : vector<2x32xf32>
    %155 = math.exp %154 : vector<2x32xf32>
    %cst_39 = arith.constant 1.000000e+00 : f32
    %156 = vector.broadcast %cst_39 : f32 to vector<2x32xf32>
    %157 = arith.addf %156, %155 : vector<2x32xf32>
    %158 = arith.divf %156, %157 : vector<2x32xf32>
    %159 = vector.extract_strided_slice %47 {offsets = [0, 3, 0], sizes = [2, 1, 32], strides = [1, 1, 1]} : vector<2x8x32xf32> to vector<2x1x32xf32>
    %160 = vector.shape_cast %159 : vector<2x1x32xf32> to vector<2x32xf32>
    %161 = vector.extract_strided_slice %149 {offsets = [0, 32], sizes = [2, 32], strides = [1, 1]} : vector<2x64xf32> to vector<2x32xf32>
    %162 = arith.mulf %158, %161 : vector<2x32xf32>
    %163 = arith.addf %160, %162 : vector<2x32xf32>
    %164 = math.tanh %163 : vector<2x32xf32>
    %165 = vector.extract_strided_slice %52 {offsets = [0, 3, 0], sizes = [2, 1, 32], strides = [1, 1, 1]} : vector<2x8x32xf32> to vector<2x1x32xf32>
    %166 = vector.shape_cast %165 : vector<2x1x32xf32> to vector<2x32xf32>
    %167 = arith.mulf %166, %164 : vector<2x32xf32>
    %cst_40 = arith.constant 1.000000e+00 : f32
    %168 = vector.broadcast %cst_40 : f32 to vector<2x32xf32>
    %169 = arith.subf %168, %166 : vector<2x32xf32>
    %170 = arith.mulf %169, %141 : vector<2x32xf32>
    %171 = arith.addf %167, %170 : vector<2x32xf32>
    %c3_i32 = arith.constant 3 : i32
    %172 = vector.broadcast %c3_i32 : i32 to vector<2x1xi32>
    %173 = arith.cmpi eq, %56, %172 : vector<2x1xi32>
    %174 = vector.shape_cast %173 : vector<2x1xi1> to vector<2x1xi1>
    %175 = vector.broadcast %174 : vector<2x1xi1> to vector<2x32xi1>
    %176 = arith.select %175, %171, %146 : vector<2x32xi1>, vector<2x32xf32>
    %cst_41 = arith.constant dense<0.000000e+00> : vector<2x64xf32>
    %177 = tpu.matmul %171, %48, %cst_41 {dimension_numbers = #tpu.dot_dimension_numbers<[1], [0], [0], [1], [0, 0, 1, 1], [], []>} : vector<2x32xf32>, vector<32x64xf32>, vector<2x64xf32> -> vector<2x64xf32>
    %178 = vector.broadcast %49 : vector<1x64xf32> to vector<2x64xf32>
    %179 = arith.addf %177, %178 : vector<2x64xf32>
    %180 = vector.extract_strided_slice %46 {offsets = [0, 4, 0], sizes = [2, 1, 32], strides = [1, 1, 1]} : vector<2x8x32xf32> to vector<2x1x32xf32>
    %181 = vector.shape_cast %180 : vector<2x1x32xf32> to vector<2x32xf32>
    %182 = vector.extract_strided_slice %179 {offsets = [0, 0], sizes = [2, 32], strides = [1, 1]} : vector<2x64xf32> to vector<2x32xf32>
    %183 = arith.addf %181, %182 : vector<2x32xf32>
    %184 = arith.negf %183 : vector<2x32xf32>
    %185 = math.exp %184 : vector<2x32xf32>
    %cst_42 = arith.constant 1.000000e+00 : f32
    %186 = vector.broadcast %cst_42 : f32 to vector<2x32xf32>
    %187 = arith.addf %186, %185 : vector<2x32xf32>
    %188 = arith.divf %186, %187 : vector<2x32xf32>
    %189 = vector.extract_strided_slice %47 {offsets = [0, 4, 0], sizes = [2, 1, 32], strides = [1, 1, 1]} : vector<2x8x32xf32> to vector<2x1x32xf32>
    %190 = vector.shape_cast %189 : vector<2x1x32xf32> to vector<2x32xf32>
    %191 = vector.extract_strided_slice %179 {offsets = [0, 32], sizes = [2, 32], strides = [1, 1]} : vector<2x64xf32> to vector<2x32xf32>
    %192 = arith.mulf %188, %191 : vector<2x32xf32>
    %193 = arith.addf %190, %192 : vector<2x32xf32>
    %194 = math.tanh %193 : vector<2x32xf32>
    %195 = vector.extract_strided_slice %52 {offsets = [0, 4, 0], sizes = [2, 1, 32], strides = [1, 1, 1]} : vector<2x8x32xf32> to vector<2x1x32xf32>
    %196 = vector.shape_cast %195 : vector<2x1x32xf32> to vector<2x32xf32>
    %197 = arith.mulf %196, %194 : vector<2x32xf32>
    %cst_43 = arith.constant 1.000000e+00 : f32
    %198 = vector.broadcast %cst_43 : f32 to vector<2x32xf32>
    %199 = arith.subf %198, %196 : vector<2x32xf32>
    %200 = arith.mulf %199, %171 : vector<2x32xf32>
    %201 = arith.addf %197, %200 : vector<2x32xf32>
    %c4_i32 = arith.constant 4 : i32
    %202 = vector.broadcast %c4_i32 : i32 to vector<2x1xi32>
    %203 = arith.cmpi eq, %56, %202 : vector<2x1xi32>
    %204 = vector.shape_cast %203 : vector<2x1xi1> to vector<2x1xi1>
    %205 = vector.broadcast %204 : vector<2x1xi1> to vector<2x32xi1>
    %206 = arith.select %205, %201, %176 : vector<2x32xi1>, vector<2x32xf32>
    %cst_44 = arith.constant dense<0.000000e+00> : vector<2x64xf32>
    %207 = tpu.matmul %201, %48, %cst_44 {dimension_numbers = #tpu.dot_dimension_numbers<[1], [0], [0], [1], [0, 0, 1, 1], [], []>} : vector<2x32xf32>, vector<32x64xf32>, vector<2x64xf32> -> vector<2x64xf32>
    %208 = vector.broadcast %49 : vector<1x64xf32> to vector<2x64xf32>
    %209 = arith.addf %207, %208 : vector<2x64xf32>
    %210 = vector.extract_strided_slice %46 {offsets = [0, 5, 0], sizes = [2, 1, 32], strides = [1, 1, 1]} : vector<2x8x32xf32> to vector<2x1x32xf32>
    %211 = vector.shape_cast %210 : vector<2x1x32xf32> to vector<2x32xf32>
    %212 = vector.extract_strided_slice %209 {offsets = [0, 0], sizes = [2, 32], strides = [1, 1]} : vector<2x64xf32> to vector<2x32xf32>
    %213 = arith.addf %211, %212 : vector<2x32xf32>
    %214 = arith.negf %213 : vector<2x32xf32>
    %215 = math.exp %214 : vector<2x32xf32>
    %cst_45 = arith.constant 1.000000e+00 : f32
    %216 = vector.broadcast %cst_45 : f32 to vector<2x32xf32>
    %217 = arith.addf %216, %215 : vector<2x32xf32>
    %218 = arith.divf %216, %217 : vector<2x32xf32>
    %219 = vector.extract_strided_slice %47 {offsets = [0, 5, 0], sizes = [2, 1, 32], strides = [1, 1, 1]} : vector<2x8x32xf32> to vector<2x1x32xf32>
    %220 = vector.shape_cast %219 : vector<2x1x32xf32> to vector<2x32xf32>
    %221 = vector.extract_strided_slice %209 {offsets = [0, 32], sizes = [2, 32], strides = [1, 1]} : vector<2x64xf32> to vector<2x32xf32>
    %222 = arith.mulf %218, %221 : vector<2x32xf32>
    %223 = arith.addf %220, %222 : vector<2x32xf32>
    %224 = math.tanh %223 : vector<2x32xf32>
    %225 = vector.extract_strided_slice %52 {offsets = [0, 5, 0], sizes = [2, 1, 32], strides = [1, 1, 1]} : vector<2x8x32xf32> to vector<2x1x32xf32>
    %226 = vector.shape_cast %225 : vector<2x1x32xf32> to vector<2x32xf32>
    %227 = arith.mulf %226, %224 : vector<2x32xf32>
    %cst_46 = arith.constant 1.000000e+00 : f32
    %228 = vector.broadcast %cst_46 : f32 to vector<2x32xf32>
    %229 = arith.subf %228, %226 : vector<2x32xf32>
    %230 = arith.mulf %229, %201 : vector<2x32xf32>
    %231 = arith.addf %227, %230 : vector<2x32xf32>
    %c5_i32 = arith.constant 5 : i32
    %232 = vector.broadcast %c5_i32 : i32 to vector<2x1xi32>
    %233 = arith.cmpi eq, %56, %232 : vector<2x1xi32>
    %234 = vector.shape_cast %233 : vector<2x1xi1> to vector<2x1xi1>
    %235 = vector.broadcast %234 : vector<2x1xi1> to vector<2x32xi1>
    %236 = arith.select %235, %231, %206 : vector<2x32xi1>, vector<2x32xf32>
    %cst_47 = arith.constant dense<0.000000e+00> : vector<2x64xf32>
    %237 = tpu.matmul %231, %48, %cst_47 {dimension_numbers = #tpu.dot_dimension_numbers<[1], [0], [0], [1], [0, 0, 1, 1], [], []>} : vector<2x32xf32>, vector<32x64xf32>, vector<2x64xf32> -> vector<2x64xf32>
    %238 = vector.broadcast %49 : vector<1x64xf32> to vector<2x64xf32>
    %239 = arith.addf %237, %238 : vector<2x64xf32>
    %240 = vector.extract_strided_slice %46 {offsets = [0, 6, 0], sizes = [2, 1, 32], strides = [1, 1, 1]} : vector<2x8x32xf32> to vector<2x1x32xf32>
    %241 = vector.shape_cast %240 : vector<2x1x32xf32> to vector<2x32xf32>
    %242 = vector.extract_strided_slice %239 {offsets = [0, 0], sizes = [2, 32], strides = [1, 1]} : vector<2x64xf32> to vector<2x32xf32>
    %243 = arith.addf %241, %242 : vector<2x32xf32>
    %244 = arith.negf %243 : vector<2x32xf32>
    %245 = math.exp %244 : vector<2x32xf32>
    %cst_48 = arith.constant 1.000000e+00 : f32
    %246 = vector.broadcast %cst_48 : f32 to vector<2x32xf32>
    %247 = arith.addf %246, %245 : vector<2x32xf32>
    %248 = arith.divf %246, %247 : vector<2x32xf32>
    %249 = vector.extract_strided_slice %47 {offsets = [0, 6, 0], sizes = [2, 1, 32], strides = [1, 1, 1]} : vector<2x8x32xf32> to vector<2x1x32xf32>
    %250 = vector.shape_cast %249 : vector<2x1x32xf32> to vector<2x32xf32>
    %251 = vector.extract_strided_slice %239 {offsets = [0, 32], sizes = [2, 32], strides = [1, 1]} : vector<2x64xf32> to vector<2x32xf32>
    %252 = arith.mulf %248, %251 : vector<2x32xf32>
    %253 = arith.addf %250, %252 : vector<2x32xf32>
    %254 = math.tanh %253 : vector<2x32xf32>
    %255 = vector.extract_strided_slice %52 {offsets = [0, 6, 0], sizes = [2, 1, 32], strides = [1, 1, 1]} : vector<2x8x32xf32> to vector<2x1x32xf32>
    %256 = vector.shape_cast %255 : vector<2x1x32xf32> to vector<2x32xf32>
    %257 = arith.mulf %256, %254 : vector<2x32xf32>
    %cst_49 = arith.constant 1.000000e+00 : f32
    %258 = vector.broadcast %cst_49 : f32 to vector<2x32xf32>
    %259 = arith.subf %258, %256 : vector<2x32xf32>
    %260 = arith.mulf %259, %231 : vector<2x32xf32>
    %261 = arith.addf %257, %260 : vector<2x32xf32>
    %c6_i32 = arith.constant 6 : i32
    %262 = vector.broadcast %c6_i32 : i32 to vector<2x1xi32>
    %263 = arith.cmpi eq, %56, %262 : vector<2x1xi32>
    %264 = vector.shape_cast %263 : vector<2x1xi1> to vector<2x1xi1>
    %265 = vector.broadcast %264 : vector<2x1xi1> to vector<2x32xi1>
    %266 = arith.select %265, %261, %236 : vector<2x32xi1>, vector<2x32xf32>
    %cst_50 = arith.constant dense<0.000000e+00> : vector<2x64xf32>
    %267 = tpu.matmul %261, %48, %cst_50 {dimension_numbers = #tpu.dot_dimension_numbers<[1], [0], [0], [1], [0, 0, 1, 1], [], []>} : vector<2x32xf32>, vector<32x64xf32>, vector<2x64xf32> -> vector<2x64xf32>
    %268 = vector.broadcast %49 : vector<1x64xf32> to vector<2x64xf32>
    %269 = arith.addf %267, %268 : vector<2x64xf32>
    %270 = vector.extract_strided_slice %46 {offsets = [0, 7, 0], sizes = [2, 1, 32], strides = [1, 1, 1]} : vector<2x8x32xf32> to vector<2x1x32xf32>
    %271 = vector.shape_cast %270 : vector<2x1x32xf32> to vector<2x32xf32>
    %272 = vector.extract_strided_slice %269 {offsets = [0, 0], sizes = [2, 32], strides = [1, 1]} : vector<2x64xf32> to vector<2x32xf32>
    %273 = arith.addf %271, %272 : vector<2x32xf32>
    %274 = arith.negf %273 : vector<2x32xf32>
    %275 = math.exp %274 : vector<2x32xf32>
    %cst_51 = arith.constant 1.000000e+00 : f32
    %276 = vector.broadcast %cst_51 : f32 to vector<2x32xf32>
    %277 = arith.addf %276, %275 : vector<2x32xf32>
    %278 = arith.divf %276, %277 : vector<2x32xf32>
    %279 = vector.extract_strided_slice %47 {offsets = [0, 7, 0], sizes = [2, 1, 32], strides = [1, 1, 1]} : vector<2x8x32xf32> to vector<2x1x32xf32>
    %280 = vector.shape_cast %279 : vector<2x1x32xf32> to vector<2x32xf32>
    %281 = vector.extract_strided_slice %269 {offsets = [0, 32], sizes = [2, 32], strides = [1, 1]} : vector<2x64xf32> to vector<2x32xf32>
    %282 = arith.mulf %278, %281 : vector<2x32xf32>
    %283 = arith.addf %280, %282 : vector<2x32xf32>
    %284 = math.tanh %283 : vector<2x32xf32>
    %285 = vector.extract_strided_slice %52 {offsets = [0, 7, 0], sizes = [2, 1, 32], strides = [1, 1, 1]} : vector<2x8x32xf32> to vector<2x1x32xf32>
    %286 = vector.shape_cast %285 : vector<2x1x32xf32> to vector<2x32xf32>
    %287 = arith.mulf %286, %284 : vector<2x32xf32>
    %cst_52 = arith.constant 1.000000e+00 : f32
    %288 = vector.broadcast %cst_52 : f32 to vector<2x32xf32>
    %289 = arith.subf %288, %286 : vector<2x32xf32>
    %290 = arith.mulf %289, %261 : vector<2x32xf32>
    %291 = arith.addf %287, %290 : vector<2x32xf32>
    %c7_i32 = arith.constant 7 : i32
    %292 = vector.broadcast %c7_i32 : i32 to vector<2x1xi32>
    %293 = arith.cmpi eq, %56, %292 : vector<2x1xi32>
    %294 = vector.shape_cast %293 : vector<2x1xi1> to vector<2x1xi1>
    %295 = vector.broadcast %294 : vector<2x1xi1> to vector<2x32xi1>
    %296 = arith.select %295, %291, %266 : vector<2x32xi1>, vector<2x32xf32>
    %c0_53 = arith.constant 0 : index
    %c0_54 = arith.constant 0 : index
    %297 = vector.load %arg12[%c0_53, %c0_54] : memref<64x32xf32, #tpu.memory_space<vmem>>, vector<64x32xf32>
    %cst_55 = arith.constant dense<0.000000e+00> : vector<2x32xf32>
    %298 = tpu.matmul %2, %297, %cst_55 {dimension_numbers = #tpu.dot_dimension_numbers<[1], [0], [0], [1], [0, 0, 1, 1], [], []>} : vector<2x64xf32>, vector<64x32xf32>, vector<2x32xf32> -> vector<2x32xf32>
    %c0_56 = arith.constant 0 : index
    %c0_57 = arith.constant 0 : index
    %299 = vector.load %arg13[%c0_56, %c0_57] : memref<32x32xf32, #tpu.memory_space<vmem>>, vector<32x32xf32>
    %cst_58 = arith.constant dense<0.000000e+00> : vector<2x32xf32>
    %300 = tpu.matmul %296, %299, %cst_58 {dimension_numbers = #tpu.dot_dimension_numbers<[1], [0], [0], [1], [0, 0, 1, 1], [], []>} : vector<2x32xf32>, vector<32x32xf32>, vector<2x32xf32> -> vector<2x32xf32>
    %301 = arith.addf %298, %300 : vector<2x32xf32>
    %c0_59 = arith.constant 0 : index
    %c0_60 = arith.constant 0 : index
    %302 = vector.load %arg14[%c0_59, %c0_60] : memref<1x32xf32, #tpu.memory_space<vmem>>, vector<1x32xf32>
    %303 = vector.broadcast %302 : vector<1x32xf32> to vector<2x32xf32>
    %304 = arith.addf %301, %303 : vector<2x32xf32>
    %cst_61 = arith.constant 0.000000e+00 : f32
    %305 = vector.broadcast %cst_61 : f32 to vector<2x32xf32>
    %306 = arith.maximumf %304, %305 : vector<2x32xf32>
    %c0_62 = arith.constant 0 : index
    %c0_63 = arith.constant 0 : index
    %307 = vector.load %arg15[%c0_62, %c0_63] : memref<2x32xf32, #tpu.memory_space<vmem>>, vector<2x32xf32>
    tpu.vector_store %arg15[%c0_62, %c0_63], %306 {strides = array<i32>} : memref<2x32xf32, #tpu.memory_space<vmem>>, vector<2x32xf32>,
    return
  }
  func.func @transform_0(%arg0: i32) -> (i32, i32) {
    %c0_i32 = arith.constant 0 : i32
    %c0_i32_0 = arith.constant 0 : i32
    return %arg0, %c0_i32 : i32, i32
  }
  func.func @transform_1(%arg0: i32) -> (i32, i32) {
    %c0_i32 = arith.constant 0 : i32
    %c0_i32_0 = arith.constant 0 : i32
    return %arg0, %c0_i32 : i32, i32
  }
  func.func @transform_2(%arg0: i32) -> (i32, i32, i32) {
    %c0_i32 = arith.constant 0 : i32
    %c0_i32_0 = arith.constant 0 : i32
    %c0_i32_1 = arith.constant 0 : i32
    return %arg0, %c0_i32, %c0_i32_0 : i32, i32, i32
  }
  func.func @transform_3(%arg0: i32) -> (i32, i32) {
    %c0_i32 = arith.constant 0 : i32
    %c0_i32_0 = arith.constant 0 : i32
    return %arg0, %c0_i32 : i32, i32
  }
  func.func @transform_4(%arg0: i32) -> (i32, i32) {
    %c0_i32 = arith.constant 0 : i32
    %c0_i32_0 = arith.constant 0 : i32
    %c0_i32_1 = arith.constant 0 : i32
    return %c0_i32, %c0_i32_0 : i32, i32
  }
  func.func @transform_5(%arg0: i32) -> (i32, i32) {
    %c0_i32 = arith.constant 0 : i32
    %c0_i32_0 = arith.constant 0 : i32
    %c0_i32_1 = arith.constant 0 : i32
    return %c0_i32, %c0_i32_0 : i32, i32
  }
  func.func @transform_6(%arg0: i32) -> (i32, i32) {
    %c0_i32 = arith.constant 0 : i32
    %c0_i32_0 = arith.constant 0 : i32
    %c0_i32_1 = arith.constant 0 : i32
    return %c0_i32, %c0_i32_0 : i32, i32
  }
  func.func @transform_7(%arg0: i32) -> (i32, i32) {
    %c0_i32 = arith.constant 0 : i32
    %c0_i32_0 = arith.constant 0 : i32
    %c0_i32_1 = arith.constant 0 : i32
    return %c0_i32, %c0_i32_0 : i32, i32
  }
  func.func @transform_8(%arg0: i32) -> (i32, i32) {
    %c0_i32 = arith.constant 0 : i32
    %c0_i32_0 = arith.constant 0 : i32
    %c0_i32_1 = arith.constant 0 : i32
    return %c0_i32, %c0_i32_0 : i32, i32
  }
  func.func @transform_9(%arg0: i32) -> (i32, i32) {
    %c0_i32 = arith.constant 0 : i32
    %c0_i32_0 = arith.constant 0 : i32
    %c0_i32_1 = arith.constant 0 : i32
    return %c0_i32, %c0_i32_0 : i32, i32
  }
  func.func @transform_10(%arg0: i32) -> (i32, i32) {
    %c0_i32 = arith.constant 0 : i32
    %c0_i32_0 = arith.constant 0 : i32
    %c0_i32_1 = arith.constant 0 : i32
    return %c0_i32, %c0_i32_0 : i32, i32
  }
  func.func @transform_11(%arg0: i32) -> (i32, i32) {
    %c0_i32 = arith.constant 0 : i32
    %c0_i32_0 = arith.constant 0 : i32
    %c0_i32_1 = arith.constant 0 : i32
    return %c0_i32, %c0_i32_0 : i32, i32
  }
  func.func @transform_12(%arg0: i32) -> (i32, i32) {
    %c0_i32 = arith.constant 0 : i32
    %c0_i32_0 = arith.constant 0 : i32
    %c0_i32_1 = arith.constant 0 : i32
    return %c0_i32, %c0_i32_0 : i32, i32
  }
  func.func @transform_13(%arg0: i32) -> (i32, i32) {
    %c0_i32 = arith.constant 0 : i32
    %c0_i32_0 = arith.constant 0 : i32
    %c0_i32_1 = arith.constant 0 : i32
    return %c0_i32, %c0_i32_0 : i32, i32
  }
  func.func @transform_14(%arg0: i32) -> (i32, i32) {
    %c0_i32 = arith.constant 0 : i32
    %c0_i32_0 = arith.constant 0 : i32
    return %arg0, %c0_i32 : i32, i32
  }
}

</mosaic_0001>

<bundles_post_ra>
// kernel: tpu_custom_call.1
= control target key start
LH: loop header
LB: loop body
LE: loop exit
PB: predicated region body
PF: predicated region fallthrough
CT: control target
= control target key end

     0   :  { %s2040_s0 = inlined_call_operand.vmem [shape: f32[2,128], index: 0, kind: input, shape index: {}]   ;;  %s2041_s1 = inlined_call_operand.vmem [shape: f32[2,64], index: 1, kind: input, shape index: {}]   ;;  %s2042_s2 = inlined_call_operand.vmem [shape: f32[2,8,32], index: 2, kind: input, shape index: {}]   ;;  %s2043_s3 = inlined_call_operand.vmem [shape: s32[2,1], index: 3, kind: input, shape index: {}]   ;;  %s2044_s4 = inlined_call_operand.vmem [shape: f32[128,32], index: 4, kind: input, shape index: {}]   ;;  %s2045_s5 = inlined_call_operand.vmem [shape: f32[1,32], index: 5, kind: input, shape index: {}]   ;;  %s2046_s6 = inlined_call_operand.vmem [shape: f32[1,32], index: 6, kind: input, shape index: {}]   ;;  %s2047_s7 = inlined_call_operand.<no memory space> [shape: f32[1,1], index: 7, kind: input, shape index: {}]   ;;  %s2048_s8 = inlined_call_operand.vmem [shape: f32[32,64], index: 8, kind: input, shape index: {}]   ;;  %s2049_s9 = inlined_call_operand.vmem [shape: f32[32,64], index: 9, kind: input, shape index: {}]   ;;  %s2050_s10 = inlined_call_operand.vmem [shape: f32[1,64], index: 10, kind: input, shape index: {}]   ;;  %s2051_s11 = inlined_call_operand.vmem [shape: f32[64,32], index: 11, kind: input, shape index: {}]   ;;  %s2052_s12 = inlined_call_operand.vmem [shape: f32[32,32], index: 12, kind: input, shape index: {}]   ;;  %s2053_s13 = inlined_call_operand.vmem [shape: f32[1,32], index: 13, kind: input, shape index: {}]   ;;  %s2054_s14 = inlined_call_operand.hbm [shape: f32[2,32], index: 14, kind: output, shape index: {}]  }
   0x1   :  { %v19_v0 = vstv %s2047_s7 }
   0x2   :  { %20 = vst [vmem:[#allocation2] sm:$0x1] %v19_v0 }
   0x3   :  { %v1588_v1 = vld [vmem:[%s2042_s2] sm:$0xff]  ;;  %v116_v2 = vld [vmem:[%s2044_s4 + $0x78] sm:$0xff]  ;;  %s1502_s19 = smov 96   ;;  %s1503_s20 = smov 32   ;;  %v1600_v3 = vld [vmem:[%s2042_s2 + $0x8] sm:$0xff] }
   0x4   :  { %69 = vrot.lane.b32.xlu1 %v1588_v1, %s1502_s19  ;;  %57 = vrot.lane.b32.xlu0 %v1588_v1, %s1503_s20  ;;  %v115_v4 = vld [vmem:[%s2044_s4 + $0x70] sm:$0xff]  ;;  %s1504_s24 = smov 64   ;;  %v114_v5 = vld [vmem:[%s2044_s4 + $0x68] sm:$0xff] }
   0x5   :  { %65 = vrot.lane.b32.xlu2 %v1600_v3, %s1504_s24  ;;  %121 = vmatpush.msra.mxu0 %v116_v2  ;;  %v113_v6 = vld [vmem:[%s2044_s4 + $0x60] sm:$0xff] }
   0x7   :  { %122 = vmatpush.msra.mxu0 %v115_v4 }
   0x8   :  { %21 = vsyncpa [#allocation4], 0  ;;  %v112_v7 = vld [vmem:[%s2044_s4 + $0x58] sm:$0xff]  ;;  %v111_v8 = vld [vmem:[%s2044_s4 + $0x50] sm:$0xff]  ;;  %v96_v23 = vlaneseq  ;;  %vm75_vm0 = vcmask 261120   ;;  %vm78_vm1 = vcmask 523264  }
   0x9   :  { %123 = vmatpush.msra.mxu0 %v114_v5  ;;  %v110_v9 = vld [vmem:[%s2044_s4 + $0x48] sm:$0xff]  ;;  %v109_v10 = vld [vmem:[%s2044_s4 + $0x40] sm:$0xff]  ;;  %v108_v11 = vld [vmem:[%s2044_s4 + $0x38] sm:$0xff]  ;;  %vm81_vm2 = vcmask 785408   ;;  %v1505_v47 = vmov 0   ;;  %vm175_vm4 = vcmask 1041409  }
   0xa   :  { %v107_v12 = vld [vmem:[%s2044_s4 + $0x30] sm:$0xff]  ;;  %v106_v13 = vld [vmem:[%s2044_s4 + $0x28] sm:$0xff]  ;;  %v105_v14 = vld [vmem:[%s2044_s4 + $0x20] sm:$0xff]  ;;  %v1659_v29 = vand.u32 127, %v96_v23  ;;  %1358 = vset.pattern.permute.xlu2 %v1505_v47  ;;  %1362 = vset.pattern.permute.xlu0 %v1505_v47  ;;  %vm179_vm5 = vcmask 58368   ;;  %s1506_s27 = smov [#allocation3]  }
   0xb   :  { %124 = vmatpush.msra.mxu0 %v113_v6  ;;  %v104_v15 = vld [vmem:[%s2044_s4 + $0x18] sm:$0xff]  ;;  %v103_v16 = vld [vmem:[%s2044_s4 + $0x10] sm:$0xff]  ;;  %v102_v17 = vld [vmem:[%s2044_s4 + $0x8] sm:$0xff]  ;;  %s1315_s2 = sshll.u32 %s2054_s14, 4  ;;  %s1316_s2 = int_to_ptr.hbm [resolvable:$true] %s1315_s2 }
   0xc   :  { %59 = vrot.lane.b32.xlu1 %v1600_v3, %s1503_s20  ;;  %63 = vrot.lane.b32.xlu0 %v1588_v1, %s1504_s24  ;;  %v101_v18 = vld [vmem:[%s2044_s4] sm:$0xff]  ;;  %vm98_vm3 = vcmp.lt.s32.totalorder %v1659_v29, 64  ;;  %v1669_v46 = vld [vmem:[%s2049_s9 + $0x18] sm:$0xff] }
   0xd   :  { %71 = vrot.lane.b32.xlu2 %v1600_v3, %s1502_s19  ;;  %125 = vmatpush.msra.mxu0 %v112_v7  ;;  %v52_v22 = vld [vmem:[%s2040_s0] sm:$0x3]  ;;  %v1676_v48 = vld [vmem:[%s2049_s9 + $0x10] sm:$0xff]  ;;  %v1681_v49 = vld [vmem:[%s2049_s9 + $0x8] sm:$0xff] }
   0xe   :  { %v86_v24 = vperm.slane %v52_v22, 0  ;;  %v85_v25 = vrot.slane %v52_v22, 1  ;;  %v1366_v45 = vld [vmem:[#allocation2] ss:$0 sm:$0xff]  ;;  %273 = vmatpush.msra.mxu2 %v1669_v46  ;;  %392 = vmatpush.msra.mxu3 %v1669_v46  ;;  %v207_v2 = vld [vmem:[%s2048_s8 + $0x18] sm:$0xff]  ;;  %v206_v4 = vld [vmem:[%s2048_s8 + $0x10] sm:$0xff] }
   0xf   :  { %126 = vmatpush.msra.mxu0 %v111_v8  ;;  %v1689_v50 = vld [vmem:[%s2049_s9] sm:$0xff]  ;;  %224 = vmatpush.msra.mxu1 %v207_v2  ;;  %v205_v5 = vld [vmem:[%s2048_s8 + $0x8] sm:$0xff] }
  0x10   :  { %v87_v36 = vperm.slane %v85_v25, 0  ;;  %274 = vmatpush.msra.mxu2 %v1676_v48  ;;  %393 = vmatpush.msra.mxu3 %v1676_v48  ;;  %v1696_v51 = vld [vmem:[%s2041_s1] sm:$0x3] }
  0x11   :  { %127 = vmatpush.msra.mxu0 %v110_v9  ;;  %v54_v52 = vld [vmem:[%s2043_s3] sm:$0x3]  ;;  %225 = vmatpush.msra.mxu1 %v206_v4 }
  0x12   :  { %275 = vmatpush.msra.mxu2 %v1681_v49  ;;  %394 = vmatpush.msra.mxu3 %v1681_v49  ;;  %v1364_v53 = vld [vmem:[%s2045_s5] ss:$0 sm:$0xff] }
  0x13   :  { %128 = vmatpush.msra.mxu0 %v109_v10  ;;  %v1365_v56 = vld [vmem:[%s2046_s6] ss:$0 sm:$0xff]  ;;  %226 = vmatpush.msra.mxu1 %v205_v5 }
  0x14   :  { %276 = vmatpush.msra.mxu2 %v1689_v50  ;;  %395 = vmatpush.msra.mxu3 %v1689_v50  ;;  %v204_v6 = vld [vmem:[%s2048_s8] sm:$0xff] }
  0x15   :  { %129 = vmatpush.msra.mxu0 %v108_v11  ;;  %162 = vperm.xlu2 %1358, %v1366_v45   ;;  %v1745_v7 = vld [vmem:[%s2050_s10] ss:$0 sm:$0xff]  ;;  %v242_v45 = vshrl.u32 %v96_v23, 7 }
  0x16   :  { %1327 = vmatmul.msk.f32.vlgmr.msra.gmra.mxu2 %vm75_vm0, %v1696_v51  ;;  %637 = vmatpush.msrb.mxu3 %v1669_v46 }
  0x17   :  { %130 = vmatpush.msra.mxu0 %v107_v12  ;;  %513 = vmatpush.msrb.mxu2 %v1669_v46 }
  0x18   :  { %638 = vmatpush.msrb.mxu3 %v1676_v48  ;;  %227 = vmatpush.msra.mxu1 %v204_v6 }
  0x19   :  { %131 = vmatpush.msra.mxu0 %v106_v13  ;;  %514 = vmatpush.msrb.mxu2 %v1676_v48 }
  0x1a   :  { %639 = vmatpush.msrb.mxu3 %v1681_v49  ;;  %1324 = vmatmul.msk.f32.vlgmr.msra.gmra.mxu1 %vm75_vm0, %v1588_v1 }
  0x1b   :  { %132 = vmatpush.msra.mxu0 %v105_v14  ;;  %515 = vmatpush.msrb.mxu2 %v1681_v49 }
  0x1c   :  { %640 = vmatpush.msrb.mxu3 %v1689_v50  ;;  %761 = vmatpush.msrb.mxu1 %v1669_v46 }
  0x1d   :  { %133 = vmatpush.msra.mxu0 %v104_v15  ;;  %168 = vperm.xlu2 %1358, %v54_v52  }
  0x1e   :  { %516 = vmatpush.msrb.mxu2 %v1689_v50  ;;  %762 = vmatpush.msrb.mxu1 %v1676_v48 }
  0x1f   :  { %134 = vmatpush.msra.mxu0 %v103_v16  ;;  %1360 = vset.pattern.permute.xlu1 %v242_v45 }
  0x20   :  { %885 = vmatpush.msra.mxu2 %v1669_v46  ;;  %763 = vmatpush.msrb.mxu1 %v1681_v49 }
  0x21   :  { %135 = vmatpush.msra.mxu0 %v102_v17 }
  0x22   :  { %886 = vmatpush.msra.mxu2 %v1676_v48  ;;  %764 = vmatpush.msrb.mxu1 %v1689_v50 }
  0x23   :  { %136 = vmatpush.msra.mxu0 %v101_v18  ;;  %1325 = vmatmul.msk.f32.gmra.mxu1 %vm75_vm0, %v1600_v3 }
  0x24   :  { %887 = vmatpush.msra.mxu2 %v1681_v49  ;;  %1133 = vmatpush.msra.mxu1 %v1669_v46 }
  0x25   :  { %1359 = vset.pattern.permute.xlu2 %v242_v45 }
  0x26   :  { %888 = vmatpush.msra.mxu2 %v1689_v50  ;;  %1134 = vmatpush.msra.mxu1 %v1676_v48 }
  0x28   :  { %1135 = vmatpush.msra.mxu1 %v1681_v49 }
  0x2a   :  { %1136 = vmatpush.msra.mxu1 %v1689_v50 }
  0x5f   :  { %v66_v19 = vpop.permute.xlu2 %65 }
  0x67   :  { %v72_v32 = vpop.permute.xlu2 %71 }
  0x6f   :  { %v163_v8 = vpop.permute.xlu2 %162 }
  0x76   :  { %v70_v20 = vpop.permute.xlu1 %69  ;;  %v58_v21 = vpop.permute.xlu0 %57 }
  0x77   :  { %v76_v26 = vsel %vm75_vm0, %v1588_v1, %v58_v21  ;;  %v169_v15 = vpop.permute.xlu2 %168 }
  0x78   :  { %vm170_vm6 = vcmp.lt.s32.totalorder %v1659_v29, %v169_v15 }
  0x7e   :  { %v60_v27 = vpop.permute.xlu1 %59  ;;  %v64_v28 = vpop.permute.xlu0 %63 }
  0x7f   :  { %v77_v30 = vsel %vm75_vm0, %v1600_v3, %v60_v27  ;;  %v79_v31 = vsel %vm78_vm1, %v76_v26, %v64_v28 }
  0x80   :  { %v82_v33 = vsel %vm81_vm2, %v79_v31, %v70_v20  ;;  %v80_v34 = vsel %vm78_vm1, %v77_v30, %v66_v19 }
  0x81   :  { %v92_v35 = vsub.f32 %v82_v33, %v86_v24  ;;  %v83_v37 = vsel %vm81_vm2, %v80_v34, %v72_v32  ;;  %v90_v38 = vmul.f32 %v86_v24, %v82_v33 }
  0x82   :  { %v93_v40 = vsub.f32 %v83_v37, %v87_v36  ;;  %v91_v43 = vmul.f32 %v87_v36, %v83_v37 }
  0x83   :  { %v94_v39 = vand.u32 2147483647, %v92_v35 }
  0x84   :  { %v95_v42 = vand.u32 2147483647, %v93_v40 }
  0x85   :  { %v99_v41 = vsel %vm98_vm3, %v90_v38, %v94_v39 }
  0x86   :  { %137 = vmatmul.f32.vlgmr.msra.gmra.mxu0 %v99_v41  ;;  %v100_v44 = vsel %vm98_vm3, %v91_v43, %v95_v42 }
  0x8e   :  { %140 = vmatmul.f32.gmra.mxu0 %v100_v44 }
  0x97   :  { %v1761_v22 = vpop.f32.mrf.mxu1 }
  0x99   :  { %v278_v9 = vpop.f32.mrf.mxu2 }
  0x9a   :  { %v279_v1 = vadd.f32 %v1745_v7, %v278_v9 }
  0x9c   :  { %v282_v10 = vrot.slane %v279_v1, 1  ;;  %v285_v44 = vadd.f32 %v279_v1, %v1761_v22 }
  0x9e   :  { %v1328_v52 = vmul.f32 -1.442695, %v285_v44 }
  0xa0   :  { %v1763_v25 = vpop.f32.mrf.mxu1 }
  0xa1   :  { %v286_v26 = vadd.f32 %v282_v10, %v1763_v25 }
  0xa3   :  { %v1329_v30 = vmul.f32 -1.442695, %v286_v26 }
 0x103   :  { %v138_v54 = vpop.f32.mrf.mxu0 }
 0x104   :  { %v139_v55 = vadd.f32 %v1364_v53, %v138_v54 }
 0x106   :  { %1369 = vtanh.f32 %v139_v55 }
 0x10b   :  { %v141_v57 = vpop.f32.mrf.mxu0 }
 0x10c   :  { %v1370_v58 = vpop.eup %1369  ;;  %v142_v59 = vadd.f32 %v1364_v53, %v141_v57 }
 0x10d   :  { %v150_v60 = vmul.f32 %v1370_v58, %v1365_v56 }
 0x10e   :  { %1371 = vtanh.f32 %v142_v59 }
 0x10f   :  { %v152_v61 = vsel %vm75_vm0, %v150_v60, 0.0 }
 0x110   :  { %153 = vadd.xlane.f32.xlu0 %v152_v61 }
 0x114   :  { %v1372_v62 = vpop.eup %1371 }
 0x115   :  { %v151_v63 = vmul.f32 %v1372_v62, %v1365_v56 }
 0x117   :  { %v155_v0 = vsel %vm75_vm0, %v151_v63, 0.0 }
 0x118   :  { %156 = vadd.xlane.f32.xlu1 %v155_v0 }
 0x131   :  { %327 = vrot.lane.b32.xlu1 %v282_v10, %s1502_s19 }
 0x183   :  { %v154_v11 = vpop.xlane.xlu0 %153 }
 0x184   :  { %v165_v12 = vadd.f32 %v163_v8, %v154_v11 }
 0x186   :  { %v173_v3 = vperm.slane %v165_v12, %v1659_v29 }
 0x18b   :  { %v157_v13 = vpop.xlane.xlu1 %156 }
 0x18c   :  { %v166_v14 = vadd.f32 %v163_v8, %v157_v13 }
 0x18e   :  { %v174_v16 = vperm.slane %v166_v14, %v1659_v29 }
 0x190   :  { %v176_v17 = vsel %vm175_vm4, %v174_v16, %v173_v3 }
 0x191   :  { %v178_v18 = vsel %vm170_vm6, %v176_v17, -1e+30  ;;  %v349_v17 = vrot.slane %v1696_v51, 1 }
 0x192   :  { %v180_v19 = vsel %vm179_vm5, %v178_v18, -inf }
 0x193   :  { %181 = vmax.xlane.f32.xlu2 %v180_v19 }
 0x1a3   :  { %v328_v40 = vpop.permute.xlu1 %327 }
 0x206   :  { %v182_v20 = vpop.xlane.xlu2 %181 }
 0x207   :  { %v183_v21 = vsub.f32 %v178_v18, %v182_v20 }
 0x209   :  { %v184_v24 = vmul.f32 1.442695, %v183_v21 }
 0x20b   :  { %1373 = vpow2.f32 %v184_v24 }
 0x20c   :  { %1375 = vpow2.f32 %v1329_v30 }
 0x211   :  { %v1374_v27 = vpop.eup %1373 }
 0x212   :  { %v186_v28 = vsel %vm179_vm5, %v1374_v27, 0.0  ;;  %v1376_v29 = vpop.eup %1375 }
 0x213   :  { %187 = vadd.xlane.f32.xlu0 %v186_v28  ;;  %v294_v31 = vadd.f32 1.0, %v1376_v29 }
 0x215   :  { %1377 = vrcp.f32 %v294_v31  ;;  %v321_v34 = vand.u32 2147483648, %v294_v31  ;;  %vm315_vm7 = vweird.f32 %v294_v31  ;;  %v319_v36 = vand.u32 2147483647, %v294_v31 }
 0x216   :  { %1379 = vpow2.f32 %v1328_v52 }
 0x217   :  { %v322_v38 = vor.u32 1.1754944e-38, %v321_v34  ;;  %vm320_vm10 = vcmp.eq.f32.partialorder %v319_v36, 8.507059e+37 }
 0x21b   :  { %v1378_v32 = vpop.eup %1377 }
 0x21c   :  { %v311_v33 = vmul.f32 %v1378_v32, %v294_v31  ;;  %vm316_vm8 = vweird.f32 %v1378_v32  ;;  %v1380_v53 = vpop.eup %1379 }
 0x21d   :  { %vm317_vm9 = vmor %vm315_vm7, %vm316_vm8  ;;  %v293_v54 = vadd.f32 1.0, %v1380_v53 }
 0x21e   :  { %v312_v35 = vsub.f32 1.0, %v311_v33 }
 0x21f   :  { %1381 = vrcp.f32 %v293_v54  ;;  %vm300_vm15 = vweird.f32 %v293_v54  ;;  %v306_v9 = vand.u32 2147483648, %v293_v54  ;;  %v304_v10 = vand.u32 2147483647, %v293_v54 }
 0x220   :  { %v313_v37 = vmul.f32 %v1378_v32, %v312_v35 }
 0x221   :  { %v307_v13 = vor.u32 1.1754944e-38, %v306_v9  ;;  %vm305_vm5 = vcmp.eq.f32.partialorder %v304_v10, 8.507059e+37 }
 0x222   :  { %v314_v39 = vadd.f32 %v1378_v32, %v313_v37 }
 0x224   :  { %v318_v41 = vsel %vm317_vm9, %v1378_v32, %v314_v39 }
 0x225   :  { %v323_v42 = vsel %vm320_vm10, %v322_v38, %v318_v41  ;;  %v1382_v56 = vpop.eup %1381 }
 0x226   :  { %v332_v43 = vmul.f32 %v328_v40, %v323_v42  ;;  %v296_v59 = vmul.f32 %v1382_v56, %v293_v54  ;;  %vm301_vm2 = vweird.f32 %v1382_v56 }
 0x227   :  { %325 = vrot.lane.b32.xlu0 %v279_v1, %s1502_s19  ;;  %vm302_vm3 = vmor %vm300_vm15, %vm301_vm2 }
 0x228   :  { %v297_v0 = vsub.f32 1.0, %v296_v59 }
 0x22a   :  { %v298_v4 = vmul.f32 %v1382_v56, %v297_v0 }
 0x22c   :  { %v299_v1 = vadd.f32 %v1382_v56, %v298_v4 }
 0x22e   :  { %v303_v14 = vsel %vm302_vm3, %v1382_v56, %v299_v1 }
 0x22f   :  { %337 = vrot.lane.b32.xlu0 %v332_v43, %s1503_s20  ;;  %v308_v3 = vsel %vm305_vm5, %v307_v13, %v303_v14 }
 0x286   :  { %v188_v55 = vpop.xlane.xlu0 %187 }
 0x287   :  { %1383 = vrcp.f32 %v188_v55  ;;  %v200_v61 = vand.u32 2147483648, %v188_v55  ;;  %v198_v63 = vand.u32 2147483647, %v188_v55  ;;  %vm194_vm12 = vweird.f32 %v188_v55 }
 0x289   :  { %v201_v2 = vor.u32 1.1754944e-38, %v200_v61  ;;  %vm199_vm14 = vcmp.eq.f32.partialorder %v198_v63, 8.507059e+37 }
 0x28d   :  { %v1384_v57 = vpop.eup %1383 }
 0x28e   :  { %v190_v58 = vmul.f32 %v1384_v57, %v188_v55  ;;  %vm195_vm11 = vweird.f32 %v1384_v57 }
 0x28f   :  { %vm196_vm13 = vmor %vm194_vm12, %vm195_vm11 }
 0x290   :  { %v191_v60 = vsub.f32 1.0, %v190_v58 }
 0x292   :  { %v192_v62 = vmul.f32 %v1384_v57, %v191_v60 }
 0x294   :  { %v193_v23 = vadd.f32 %v1384_v57, %v192_v62 }
 0x296   :  { %v197_v5 = vsel %vm196_vm13, %v1384_v57, %v193_v23 }
 0x297   :  { %v202_v6 = vsel %vm199_vm14, %v201_v2, %v197_v5 }
 0x298   :  { %v203_v8 = vmul.f32 %v1374_v27, %v202_v6 }
 0x299   :  { %v326_v15 = vpop.permute.xlu0 %325 }
 0x29a   :  { %v247_v11 = vperm.slane %v203_v8, 1  ;;  %v240_v12 = vperm.slane %v203_v8, 0  ;;  %v331_v16 = vmul.f32 %v326_v15, %v308_v3 }
 0x29c   :  { %252 = vperm.xlu2 %1359, %v247_v11   ;;  %245 = vperm.xlu1 %1360, %v240_v12  }
 0x2a1   :  { %v338_v27 = vpop.permute.xlu0 %337 }
 0x2a2   :  { %v342_v30 = vadd.f32 %v338_v27, %v1763_v25 }
 0x2a4   :  { %335 = vrot.lane.b32.xlu1 %v331_v16, %s1503_s20  ;;  %1363 = vset.pattern.permute.xlu2 %v1505_v47  ;;  %1385 = vtanh.f32 %v342_v30 }
 0x2a5   :  { %1361 = vset.pattern.permute.xlu1 %v1505_v47 }
 0x2aa   :  { %v1386_v31 = vpop.eup %1385 }
 0x2f6   :  { %v1774_v18 = vpop.permute.xlu2 %252 }
 0x2f7   :  { %v1777_v19 = vsub.f32 1.0, %v1774_v18  ;;  %v346_v33 = vmul.f32 %v1386_v31, %v1774_v18 }
 0x2f9   :  { %v353_v20 = vmul.f32 %v349_v17, %v1777_v19 }
 0x2fb   :  { %358 = vrot.lane.b32.xlu0 %v353_v20, %s1503_s20 }
 0x30e   :  { %v1781_v21 = vpop.permute.xlu1 %245 }
 0x30f   :  { %v1784_v24 = vsub.f32 1.0, %v1781_v21 }
 0x311   :  { %v352_v26 = vmul.f32 %v1784_v24, %v1696_v51 }
 0x313   :  { %356 = vrot.lane.b32.xlu2 %v352_v26, %s1503_s20 }
 0x316   :  { %v336_v28 = vpop.permute.xlu1 %335 }
 0x317   :  { %v341_v29 = vadd.f32 %v336_v28, %v1761_v22 }
 0x319   :  { %1387 = vtanh.f32 %v341_v29 }
 0x31f   :  { %v1388_v32 = vpop.eup %1387 }
 0x320   :  { %v345_v36 = vmul.f32 %v1388_v32, %v1781_v21 }
 0x36d   :  { %v357_v34 = vpop.permute.xlu2 %356  ;;  %v359_v35 = vpop.permute.xlu0 %358 }
 0x36e   :  { %v363_v37 = vadd.f32 %v359_v35, %v346_v33  ;;  %v362_v51 = vadd.f32 %v357_v34, %v345_v36 }
 0x370   :  { %v372_v38 = vrot.slane %v363_v37, 7  ;;  %v466_v40 = vrot.slane %v362_v51, 7 }
 0x372   :  { %v373_v39 = vsel %vm175_vm4, %v372_v38, %v362_v51 }
 0x373   :  { %374 = vrot.lane.b32.xlu1 %v373_v39, %s1502_s19 }
 0x37b   :  { %467 = vrot.lane.b32.xlu1 %v466_v40, %s1502_s19 }
 0x3e5   :  { %v1796_v41 = vpop.permute.xlu1 %374 }
 0x3e6   :  { %1330 = vmatmul.msk.f32.vlgmr.msra.gmra.mxu3 %vm75_vm0, %v1796_v41 }
 0x3e7   :  { %1009 = vmatpush.msra.mxu3 %v1669_v46 }
 0x3e9   :  { %1010 = vmatpush.msra.mxu3 %v1676_v48 }
 0x3eb   :  { %1011 = vmatpush.msra.mxu3 %v1681_v49 }
 0x3ed   :  { %1012 = vmatpush.msra.mxu3 %v1689_v50  ;;  %v468_v45 = vpop.permute.xlu1 %467 }
 0x3ee   :  { %v473_v52 = vmul.f32 %v468_v45, %v1784_v24 }
 0x469   :  { %v397_v42 = vpop.f32.mrf.mxu3 }
 0x46a   :  { %v398_v43 = vadd.f32 %v1745_v7, %v397_v42 }
 0x46c   :  { %446 = vrot.lane.b32.xlu2 %v398_v43, %s1502_s19  ;;  %v401_v44 = vrot.slane %v398_v43, 7  ;;  %v405_v46 = vadd.f32 %v398_v43, %v1763_v25 }
 0x46e   :  { %444 = vrot.lane.b32.xlu0 %v401_v44, %s1502_s19  ;;  %v1332_v48 = vmul.f32 -1.442695, %v405_v46  ;;  %v404_v53 = vadd.f32 %v401_v44, %v1761_v22 }
 0x470   :  { %1389 = vpow2.f32 %v1332_v48  ;;  %v1331_v55 = vmul.f32 -1.442695, %v404_v53 }
 0x476   :  { %469 = vrot.lane.b32.xlu0 %v372_v38, %s1502_s19  ;;  %v1390_v49 = vpop.eup %1389 }
 0x477   :  { %v413_v50 = vadd.f32 1.0, %v1390_v49 }
 0x479   :  { %1391 = vrcp.f32 %v413_v50  ;;  %v440_v62 = vand.u32 2147483648, %v413_v50  ;;  %vm434_vm7 = vweird.f32 %v413_v50  ;;  %v438_v63 = vand.u32 2147483647, %v413_v50 }
 0x47a   :  { %1393 = vpow2.f32 %v1331_v55 }
 0x47b   :  { %v441_v23 = vor.u32 1.1754944e-38, %v440_v62  ;;  %vm439_vm9 = vcmp.eq.f32.partialorder %v438_v63, 8.507059e+37 }
 0x47e   :  { %477 = vrot.lane.b32.xlu0 %v473_v52, %s1503_s20 }
 0x47f   :  { %v1392_v54 = vpop.eup %1391 }
 0x480   :  { %v430_v56 = vmul.f32 %v1392_v54, %v413_v50  ;;  %v1394_v59 = vpop.eup %1393  ;;  %vm435_vm6 = vweird.f32 %v1392_v54 }
 0x481   :  { %v412_v61 = vadd.f32 1.0, %v1394_v59  ;;  %vm436_vm8 = vmor %vm434_vm7, %vm435_vm6 }
 0x482   :  { %v431_v57 = vsub.f32 1.0, %v430_v56 }
 0x483   :  { %1395 = vrcp.f32 %v412_v61  ;;  %v425_v11 = vand.u32 2147483648, %v412_v61  ;;  %vm419_vm11 = vweird.f32 %v412_v61  ;;  %v423_v12 = vand.u32 2147483647, %v412_v61 }
 0x484   :  { %v432_v58 = vmul.f32 %v1392_v54, %v431_v57 }
 0x485   :  { %v426_v14 = vor.u32 1.1754944e-38, %v425_v11  ;;  %vm424_vm13 = vcmp.eq.f32.partialorder %v423_v12, 8.507059e+37 }
 0x486   :  { %v433_v60 = vadd.f32 %v1392_v54, %v432_v58 }
 0x488   :  { %v437_v0 = vsel %vm436_vm8, %v1392_v54, %v433_v60 }
 0x489   :  { %v442_v4 = vsel %vm439_vm9, %v441_v23, %v437_v0  ;;  %v1396_v6 = vpop.eup %1395 }
 0x48a   :  { %v415_v8 = vmul.f32 %v1396_v6, %v412_v61  ;;  %vm420_vm10 = vweird.f32 %v1396_v6 }
 0x48b   :  { %vm421_vm12 = vmor %vm419_vm11, %vm420_vm10 }
 0x48c   :  { %v416_v9 = vsub.f32 1.0, %v415_v8 }
 0x48e   :  { %v417_v1 = vmul.f32 %v1396_v6, %v416_v9 }
 0x490   :  { %v418_v10 = vadd.f32 %v1396_v6, %v417_v1 }
 0x492   :  { %v422_v13 = vsel %vm421_vm12, %v1396_v6, %v418_v10 }
 0x493   :  { %v427_v3 = vsel %vm424_vm13, %v426_v14, %v422_v13 }
 0x4c6   :  { %v447_v2 = vpop.permute.xlu2 %446 }
 0x4c7   :  { %v451_v5 = vmul.f32 %v447_v2, %v442_v4 }
 0x4c9   :  { %456 = vrot.lane.b32.xlu1 %v451_v5, %s1503_s20 }
 0x4e0   :  { %v445_v15 = vpop.permute.xlu0 %444 }
 0x4e1   :  { %v450_v16 = vmul.f32 %v445_v15, %v427_v3 }
 0x4e3   :  { %454 = vrot.lane.b32.xlu2 %v450_v16, %s1503_s20 }
 0x4e8   :  { %v470_v17 = vpop.permute.xlu0 %469 }
 0x4e9   :  { %v474_v20 = vmul.f32 %v470_v17, %v1777_v19 }
 0x4eb   :  { %479 = vrot.lane.b32.xlu2 %v474_v20, %s1503_s20 }
 0x4f0   :  { %v478_v34 = vpop.permute.xlu0 %477 }
 0x53b   :  { %v457_v26 = vpop.permute.xlu1 %456 }
 0x53c   :  { %v461_v27 = vadd.f32 %v457_v26, %v1763_v25 }
 0x53d   :  { %v455_v28 = vpop.permute.xlu2 %454 }
 0x53e   :  { %1397 = vtanh.f32 %v461_v27  ;;  %v460_v30 = vadd.f32 %v455_v28, %v1761_v22 }
 0x540   :  { %1399 = vtanh.f32 %v460_v30 }
 0x544   :  { %v1398_v29 = vpop.eup %1397 }
 0x545   :  { %v465_v33 = vmul.f32 %v1398_v29, %v1774_v18  ;;  %v480_v35 = vpop.permute.xlu2 %479 }
 0x546   :  { %v1400_v31 = vpop.eup %1399 }
 0x547   :  { %v464_v32 = vmul.f32 %v1400_v31, %v1781_v21  ;;  %v484_v37 = vadd.f32 %v480_v35, %v465_v33 }
 0x549   :  { %v483_v36 = vadd.f32 %v478_v34, %v464_v32  ;;  %v589_v52 = vrot.slane %v484_v37, 7 }
 0x54b   :  { %v493_v51 = vrot.slane %v483_v36, 1  ;;  %v588_v39 = vrot.slane %v483_v36, 7 }
 0x54d   :  { %v494_v38 = vsel %vm175_vm4, %v484_v37, %v493_v51 }
 0x54e   :  { %495 = vrot.lane.b32.xlu1 %v494_v38, %s1502_s19 }
 0x556   :  { %590 = vrot.lane.b32.xlu1 %v588_v39, %s1502_s19 }
 0x5c0   :  { %v1823_v40 = vpop.permute.xlu1 %495 }
 0x5c1   :  { %1333 = vmatmul.msk.f32.vlgmr.msrb.gmra.mxu2 %vm75_vm0, %v1823_v40 }
 0x5c8   :  { %v591_v46 = vpop.permute.xlu1 %590 }
 0x5c9   :  { %v596_v48 = vmul.f32 %v591_v46, %v1784_v24 }
 0x644   :  { %v518_v42 = vpop.f32.mrf.mxu2 }
 0x645   :  { %v519_v43 = vadd.f32 %v1745_v7, %v518_v42 }
 0x647   :  { %v522_v44 = vrot.slane %v519_v43, 6  ;;  %v523_v45 = vrot.slane %v519_v43, 7 }
 0x649   :  { %568 = vrot.lane.b32.xlu2 %v523_v45, %s1502_s19  ;;  %566 = vrot.lane.b32.xlu0 %v522_v44, %s1502_s19  ;;  %v527_v49 = vadd.f32 %v523_v45, %v1763_v25  ;;  %v526_v55 = vadd.f32 %v522_v44, %v1761_v22 }
 0x64b   :  { %v1335_v50 = vmul.f32 -1.442695, %v527_v49  ;;  %v1334_v57 = vmul.f32 -1.442695, %v526_v55 }
 0x64d   :  { %1401 = vpow2.f32 %v1335_v50 }
 0x651   :  { %592 = vrot.lane.b32.xlu0 %v589_v52, %s1502_s19 }
 0x653   :  { %v1402_v53 = vpop.eup %1401 }
 0x654   :  { %v535_v54 = vadd.f32 1.0, %v1402_v53 }
 0x656   :  { %1403 = vrcp.f32 %v535_v54  ;;  %v562_v0 = vand.u32 2147483648, %v535_v54  ;;  %vm556_vm15 = vweird.f32 %v535_v54  ;;  %v560_v23 = vand.u32 2147483647, %v535_v54 }
 0x657   :  { %1405 = vpow2.f32 %v1334_v57 }
 0x658   :  { %v563_v4 = vor.u32 1.1754944e-38, %v562_v0  ;;  %vm561_vm3 = vcmp.eq.f32.partialorder %v560_v23, 8.507059e+37 }
 0x659   :  { %600 = vrot.lane.b32.xlu0 %v596_v48, %s1503_s20 }
 0x65c   :  { %v1404_v56 = vpop.eup %1403 }
 0x65d   :  { %v552_v58 = vmul.f32 %v1404_v56, %v535_v54  ;;  %v1406_v60 = vpop.eup %1405  ;;  %vm557_vm14 = vweird.f32 %v1404_v56 }
 0x65e   :  { %v534_v62 = vadd.f32 1.0, %v1406_v60  ;;  %vm558_vm2 = vmor %vm556_vm15, %vm557_vm14 }
 0x65f   :  { %v553_v59 = vsub.f32 1.0, %v552_v58 }
 0x660   :  { %1407 = vrcp.f32 %v534_v62  ;;  %v547_v13 = vand.u32 2147483648, %v534_v62  ;;  %vm541_vm6 = vweird.f32 %v534_v62  ;;  %v545_v14 = vand.u32 2147483647, %v534_v62 }
 0x661   :  { %v554_v61 = vmul.f32 %v1404_v56, %v553_v59 }
 0x662   :  { %v548_v3 = vor.u32 1.1754944e-38, %v547_v13  ;;  %vm546_vm8 = vcmp.eq.f32.partialorder %v545_v14, 8.507059e+37 }
 0x663   :  { %v555_v63 = vadd.f32 %v1404_v56, %v554_v61 }
 0x665   :  { %v559_v2 = vsel %vm558_vm2, %v1404_v56, %v555_v63 }
 0x666   :  { %v564_v6 = vsel %vm561_vm3, %v563_v4, %v559_v2  ;;  %v1408_v9 = vpop.eup %1407 }
 0x667   :  { %v537_v1 = vmul.f32 %v1408_v9, %v534_v62  ;;  %vm542_vm5 = vweird.f32 %v1408_v9 }
 0x668   :  { %vm543_vm7 = vmor %vm541_vm6, %vm542_vm5 }
 0x669   :  { %v538_v10 = vsub.f32 1.0, %v537_v1 }
 0x66b   :  { %v539_v11 = vmul.f32 %v1408_v9, %v538_v10 }
 0x66d   :  { %v540_v12 = vadd.f32 %v1408_v9, %v539_v11 }
 0x66f   :  { %v544_v15 = vsel %vm543_vm7, %v1408_v9, %v540_v12 }
 0x670   :  { %v549_v17 = vsel %vm546_vm8, %v548_v3, %v544_v15 }
 0x6a3   :  { %v569_v5 = vpop.permute.xlu2 %568 }
 0x6a4   :  { %v573_v8 = vmul.f32 %v569_v5, %v564_v6 }
 0x6a6   :  { %578 = vrot.lane.b32.xlu1 %v573_v8, %s1503_s20 }
 0x6bb   :  { %v567_v16 = vpop.permute.xlu0 %566 }
 0x6bc   :  { %v572_v20 = vmul.f32 %v567_v16, %v549_v17 }
 0x6be   :  { %576 = vrot.lane.b32.xlu2 %v572_v20, %s1503_s20 }
 0x6c3   :  { %v593_v26 = vpop.permute.xlu0 %592 }
 0x6c4   :  { %v597_v27 = vmul.f32 %v593_v26, %v1777_v19 }
 0x6c6   :  { %602 = vrot.lane.b32.xlu2 %v597_v27, %s1503_s20 }
 0x6cb   :  { %v601_v35 = vpop.permute.xlu0 %600 }
 0x718   :  { %v577_v28 = vpop.permute.xlu2 %576  ;;  %v579_v30 = vpop.permute.xlu1 %578 }
 0x719   :  { %v582_v29 = vadd.f32 %v577_v28, %v1761_v22  ;;  %v583_v31 = vadd.f32 %v579_v30, %v1763_v25 }
 0x71b   :  { %1409 = vtanh.f32 %v582_v29 }
 0x71c   :  { %1411 = vtanh.f32 %v583_v31 }
 0x720   :  { %v603_v37 = vpop.permute.xlu2 %602 }
 0x721   :  { %v1410_v32 = vpop.eup %1409 }
 0x722   :  { %v1412_v33 = vpop.eup %1411  ;;  %v586_v34 = vmul.f32 %v1410_v32, %v1781_v21 }
 0x723   :  { %v587_v36 = vmul.f32 %v1412_v33, %v1774_v18 }
 0x724   :  { %v606_v51 = vadd.f32 %v601_v35, %v586_v34 }
 0x725   :  { %v607_v38 = vadd.f32 %v603_v37, %v587_v36 }
 0x726   :  { %v616_v39 = vrot.slane %v606_v51, 2  ;;  %v712_v44 = vrot.slane %v606_v51, 7 }
 0x727   :  { %v617_v42 = vrot.slane %v607_v38, 1  ;;  %v713_v50 = vrot.slane %v607_v38, 7 }
 0x729   :  { %v618_v43 = vsel %vm175_vm4, %v617_v42, %v616_v39 }
 0x72a   :  { %619 = vrot.lane.b32.xlu1 %v618_v43, %s1502_s19 }
 0x732   :  { %714 = vrot.lane.b32.xlu1 %v712_v44, %s1502_s19 }
 0x79c   :  { %v1846_v45 = vpop.permute.xlu1 %619 }
 0x79d   :  { %1336 = vmatmul.msk.f32.vlgmr.msrb.gmra.mxu3 %vm75_vm0, %v1846_v45 }
 0x7a4   :  { %v715_v53 = vpop.permute.xlu1 %714 }
 0x7a5   :  { %v720_v54 = vmul.f32 %v715_v53, %v1784_v24 }
 0x820   :  { %v642_v52 = vpop.f32.mrf.mxu3 }
 0x821   :  { %v643_v46 = vadd.f32 %v1745_v7, %v642_v52 }
 0x823   :  { %v646_v48 = vrot.slane %v643_v46, 5  ;;  %v647_v49 = vrot.slane %v643_v46, 6 }
 0x825   :  { %692 = vrot.lane.b32.xlu2 %v647_v49, %s1502_s19  ;;  %690 = vrot.lane.b32.xlu0 %v646_v48, %s1502_s19  ;;  %v651_v55 = vadd.f32 %v647_v49, %v1763_v25  ;;  %v650_v59 = vadd.f32 %v646_v48, %v1761_v22 }
 0x827   :  { %v1338_v56 = vmul.f32 -1.442695, %v651_v55  ;;  %v1337_v61 = vmul.f32 -1.442695, %v650_v59 }
 0x829   :  { %1413 = vpow2.f32 %v1338_v56 }
 0x82d   :  { %716 = vrot.lane.b32.xlu0 %v713_v50, %s1502_s19 }
 0x82f   :  { %v1414_v57 = vpop.eup %1413 }
 0x830   :  { %v659_v58 = vadd.f32 1.0, %v1414_v57 }
 0x832   :  { %1415 = vrcp.f32 %v659_v58  ;;  %v686_v5 = vand.u32 2147483648, %v659_v58  ;;  %vm680_vm10 = vweird.f32 %v659_v58  ;;  %v684_v6 = vand.u32 2147483647, %v659_v58 }
 0x833   :  { %1417 = vpow2.f32 %v1337_v61 }
 0x834   :  { %v687_v9 = vor.u32 1.1754944e-38, %v686_v5  ;;  %vm685_vm12 = vcmp.eq.f32.partialorder %v684_v6, 8.507059e+37 }
 0x835   :  { %724 = vrot.lane.b32.xlu0 %v720_v54, %s1503_s20 }
 0x838   :  { %v1416_v60 = vpop.eup %1415 }
 0x839   :  { %v676_v62 = vmul.f32 %v1416_v60, %v659_v58  ;;  %v1418_v0 = vpop.eup %1417  ;;  %vm681_vm9 = vweird.f32 %v1416_v60 }
 0x83a   :  { %v658_v2 = vadd.f32 1.0, %v1418_v0  ;;  %vm682_vm11 = vmor %vm680_vm10, %vm681_vm9 }
 0x83b   :  { %v677_v63 = vsub.f32 1.0, %v676_v62 }
 0x83c   :  { %1419 = vrcp.f32 %v658_v2  ;;  %v671_v16 = vand.u32 2147483648, %v658_v2  ;;  %vm665_vm14 = vweird.f32 %v658_v2  ;;  %v669_v17 = vand.u32 2147483647, %v658_v2 }
 0x83d   :  { %v678_v23 = vmul.f32 %v1416_v60, %v677_v63 }
 0x83e   :  { %v672_v26 = vor.u32 1.1754944e-38, %v671_v16  ;;  %vm670_vm2 = vcmp.eq.f32.partialorder %v669_v17, 8.507059e+37 }
 0x83f   :  { %v679_v4 = vadd.f32 %v1416_v60, %v678_v23 }
 0x841   :  { %v683_v8 = vsel %vm682_vm11, %v1416_v60, %v679_v4 }
 0x842   :  { %v688_v10 = vsel %vm685_vm12, %v687_v9, %v683_v8  ;;  %v1420_v12 = vpop.eup %1419 }
 0x843   :  { %v661_v13 = vmul.f32 %v1420_v12, %v658_v2  ;;  %vm666_vm13 = vweird.f32 %v1420_v12 }
 0x844   :  { %vm667_vm15 = vmor %vm665_vm14, %vm666_vm13 }
 0x845   :  { %v662_v14 = vsub.f32 1.0, %v661_v13 }
 0x847   :  { %v663_v15 = vmul.f32 %v1420_v12, %v662_v14 }
 0x849   :  { %v664_v3 = vadd.f32 %v1420_v12, %v663_v15 }
 0x84b   :  { %v668_v20 = vsel %vm667_vm15, %v1420_v12, %v664_v3 }
 0x84c   :  { %v673_v28 = vsel %vm670_vm2, %v672_v26, %v668_v20 }
 0x87f   :  { %v693_v1 = vpop.permute.xlu2 %692 }
 0x880   :  { %v697_v11 = vmul.f32 %v693_v1, %v688_v10 }
 0x882   :  { %702 = vrot.lane.b32.xlu1 %v697_v11, %s1503_s20 }
 0x897   :  { %v691_v27 = vpop.permute.xlu0 %690 }
 0x898   :  { %v696_v30 = vmul.f32 %v691_v27, %v673_v28 }
 0x89a   :  { %700 = vrot.lane.b32.xlu2 %v696_v30, %s1503_s20 }
 0x89f   :  { %v717_v29 = vpop.permute.xlu0 %716 }
 0x8a0   :  { %v721_v31 = vmul.f32 %v717_v29, %v1777_v19 }
 0x8a2   :  { %726 = vrot.lane.b32.xlu2 %v721_v31, %s1503_s20 }
 0x8a7   :  { %v725_v38 = vpop.permute.xlu0 %724 }
 0x8f4   :  { %v701_v32 = vpop.permute.xlu2 %700  ;;  %v703_v33 = vpop.permute.xlu1 %702 }
 0x8f5   :  { %v706_v34 = vadd.f32 %v701_v32, %v1761_v22  ;;  %v707_v35 = vadd.f32 %v703_v33, %v1763_v25 }
 0x8f7   :  { %1421 = vtanh.f32 %v706_v34 }
 0x8f8   :  { %1423 = vtanh.f32 %v707_v35 }
 0x8fc   :  { %v727_v42 = vpop.permute.xlu2 %726 }
 0x8fd   :  { %v1422_v36 = vpop.eup %1421 }
 0x8fe   :  { %v1424_v37 = vpop.eup %1423  ;;  %v710_v51 = vmul.f32 %v1422_v36, %v1781_v21 }
 0x8ff   :  { %v711_v39 = vmul.f32 %v1424_v37, %v1774_v18 }
 0x900   :  { %v730_v43 = vadd.f32 %v725_v38, %v710_v51 }
 0x901   :  { %v731_v44 = vadd.f32 %v727_v42, %v711_v39 }
 0x902   :  { %v740_v52 = vrot.slane %v730_v43, 3  ;;  %v836_v49 = vrot.slane %v730_v43, 7 }
 0x903   :  { %v741_v46 = vrot.slane %v731_v44, 2  ;;  %v837_v57 = vrot.slane %v731_v44, 7 }
 0x905   :  { %v742_v48 = vsel %vm175_vm4, %v741_v46, %v740_v52 }
 0x906   :  { %743 = vrot.lane.b32.xlu1 %v742_v48, %s1502_s19 }
 0x90e   :  { %838 = vrot.lane.b32.xlu1 %v836_v49, %s1502_s19 }
 0x978   :  { %v1869_v50 = vpop.permute.xlu1 %743 }
 0x979   :  { %1339 = vmatmul.msk.f32.vlgmr.msrb.gmra.mxu1 %vm75_vm0, %v1869_v50 }
 0x980   :  { %v839_v58 = vpop.permute.xlu1 %838 }
 0x981   :  { %v844_v59 = vmul.f32 %v839_v58, %v1784_v24 }
 0x9f6   :  { %v766_v53 = vpop.f32.mrf.mxu1 }
 0x9f7   :  { %v767_v54 = vadd.f32 %v1745_v7, %v766_v53 }
 0x9f9   :  { %v770_v55 = vrot.slane %v767_v54, 4  ;;  %v771_v56 = vrot.slane %v767_v54, 5 }
 0x9fb   :  { %816 = vrot.lane.b32.xlu2 %v771_v56, %s1502_s19  ;;  %814 = vrot.lane.b32.xlu0 %v770_v55, %s1502_s19  ;;  %v775_v60 = vadd.f32 %v771_v56, %v1763_v25  ;;  %v774_v0 = vadd.f32 %v770_v55, %v1761_v22 }
 0x9fd   :  { %v1341_v61 = vmul.f32 -1.442695, %v775_v60  ;;  %v1340_v2 = vmul.f32 -1.442695, %v774_v0 }
 0x9ff   :  { %1425 = vpow2.f32 %v1341_v61 }
 0xa03   :  { %840 = vrot.lane.b32.xlu0 %v837_v57, %s1502_s19 }
 0xa05   :  { %v1426_v62 = vpop.eup %1425 }
 0xa06   :  { %v783_v63 = vadd.f32 1.0, %v1426_v62 }
 0xa08   :  { %1427 = vrcp.f32 %v783_v63  ;;  %v810_v10 = vand.u32 2147483648, %v783_v63  ;;  %vm804_vm5 = vweird.f32 %v783_v63  ;;  %v808_v11 = vand.u32 2147483647, %v783_v63 }
 0xa09   :  { %1429 = vpow2.f32 %v1340_v2 }
 0xa0a   :  { %v811_v13 = vor.u32 1.1754944e-38, %v810_v10  ;;  %vm809_vm7 = vcmp.eq.f32.partialorder %v808_v11, 8.507059e+37 }
 0xa0b   :  { %848 = vrot.lane.b32.xlu0 %v844_v59, %s1503_s20 }
 0xa0e   :  { %v1428_v23 = vpop.eup %1427 }
 0xa0f   :  { %v800_v4 = vmul.f32 %v1428_v23, %v783_v63  ;;  %v1430_v6 = vpop.eup %1429  ;;  %vm805_vm3 = vweird.f32 %v1428_v23 }
 0xa10   :  { %v782_v9 = vadd.f32 1.0, %v1430_v6  ;;  %vm806_vm6 = vmor %vm804_vm5, %vm805_vm3 }
 0xa11   :  { %v801_v5 = vsub.f32 1.0, %v800_v4 }
 0xa12   :  { %1431 = vrcp.f32 %v782_v9  ;;  %v795_v28 = vand.u32 2147483648, %v782_v9  ;;  %vm789_vm9 = vweird.f32 %v782_v9  ;;  %v793_v30 = vand.u32 2147483647, %v782_v9 }
 0xa13   :  { %v802_v8 = vmul.f32 %v1428_v23, %v801_v5 }
 0xa14   :  { %v796_v31 = vor.u32 1.1754944e-38, %v795_v28  ;;  %vm794_vm11 = vcmp.eq.f32.partialorder %v793_v30, 8.507059e+37 }
 0xa15   :  { %v803_v1 = vadd.f32 %v1428_v23, %v802_v8 }
 0xa17   :  { %v807_v12 = vsel %vm806_vm6, %v1428_v23, %v803_v1 }
 0xa18   :  { %v812_v15 = vsel %vm809_vm7, %v811_v13, %v807_v12  ;;  %v1432_v16 = vpop.eup %1431 }
 0xa19   :  { %v785_v17 = vmul.f32 %v1432_v16, %v782_v9  ;;  %vm790_vm8 = vweird.f32 %v1432_v16 }
 0xa1a   :  { %vm791_vm10 = vmor %vm789_vm9, %vm790_vm8 }
 0xa1b   :  { %v786_v20 = vsub.f32 1.0, %v785_v17 }
 0xa1d   :  { %v787_v26 = vmul.f32 %v1432_v16, %v786_v20 }
 0xa1f   :  { %v788_v27 = vadd.f32 %v1432_v16, %v787_v26 }
 0xa21   :  { %v792_v29 = vsel %vm791_vm10, %v1432_v16, %v788_v27 }
 0xa22   :  { %v797_v33 = vsel %vm794_vm11, %v796_v31, %v792_v29 }
 0xa55   :  { %v817_v14 = vpop.permute.xlu2 %816 }
 0xa56   :  { %v821_v3 = vmul.f32 %v817_v14, %v812_v15 }
 0xa58   :  { %826 = vrot.lane.b32.xlu1 %v821_v3, %s1503_s20 }
 0xa6d   :  { %v815_v32 = vpop.permute.xlu0 %814 }
 0xa6e   :  { %v820_v34 = vmul.f32 %v815_v32, %v797_v33 }
 0xa70   :  { %824 = vrot.lane.b32.xlu2 %v820_v34, %s1503_s20 }
 0xa75   :  { %v841_v35 = vpop.permute.xlu0 %840 }
 0xa76   :  { %v845_v36 = vmul.f32 %v841_v35, %v1777_v19 }
 0xa78   :  { %850 = vrot.lane.b32.xlu2 %v845_v36, %s1503_s20 }
 0xa7d   :  { %v849_v52 = vpop.permute.xlu0 %848 }
 0xaca   :  { %v825_v37 = vpop.permute.xlu2 %824  ;;  %v827_v51 = vpop.permute.xlu1 %826 }
 0xacb   :  { %v830_v38 = vadd.f32 %v825_v37, %v1761_v22  ;;  %v831_v39 = vadd.f32 %v827_v51, %v1763_v25 }
 0xacd   :  { %1433 = vtanh.f32 %v830_v38 }
 0xace   :  { %1435 = vtanh.f32 %v831_v39 }
 0xad2   :  { %v851_v48 = vpop.permute.xlu2 %850 }
 0xad3   :  { %v1434_v42 = vpop.eup %1433 }
 0xad4   :  { %v1436_v43 = vpop.eup %1435  ;;  %v834_v44 = vmul.f32 %v1434_v42, %v1781_v21 }
 0xad5   :  { %v835_v46 = vmul.f32 %v1436_v43, %v1774_v18 }
 0xad6   :  { %v854_v49 = vadd.f32 %v849_v52, %v834_v44 }
 0xad7   :  { %v855_v53 = vadd.f32 %v851_v48, %v835_v46 }
 0xad8   :  { %v864_v54 = vrot.slane %v854_v49, 4  ;;  %v960_v57 = vrot.slane %v854_v49, 7 }
 0xad9   :  { %v865_v55 = vrot.slane %v855_v53, 3  ;;  %v961_v63 = vrot.slane %v855_v53, 7 }
 0xadb   :  { %v866_v56 = vsel %vm175_vm4, %v865_v55, %v864_v54 }
 0xadc   :  { %867 = vrot.lane.b32.xlu1 %v866_v56, %s1502_s19 }
 0xae4   :  { %962 = vrot.lane.b32.xlu1 %v960_v57, %s1502_s19 }
 0xb4e   :  { %v1892_v58 = vpop.permute.xlu1 %867 }
 0xb4f   :  { %1342 = vmatmul.msk.f32.vlgmr.msra.gmra.mxu2 %vm75_vm0, %v1892_v58 }
 0xb56   :  { %v963_v0 = vpop.permute.xlu1 %962 }
 0xb57   :  { %v968_v23 = vmul.f32 %v963_v0, %v1784_v24 }
 0xbd2   :  { %v890_v59 = vpop.f32.mrf.mxu2 }
 0xbd3   :  { %v891_v60 = vadd.f32 %v1745_v7, %v890_v59 }
 0xbd5   :  { %v894_v61 = vrot.slane %v891_v60, 3  ;;  %v895_v62 = vrot.slane %v891_v60, 4 }
 0xbd7   :  { %940 = vrot.lane.b32.xlu2 %v895_v62, %s1502_s19  ;;  %938 = vrot.lane.b32.xlu0 %v894_v61, %s1502_s19  ;;  %v899_v2 = vadd.f32 %v895_v62, %v1763_v25  ;;  %v898_v6 = vadd.f32 %v894_v61, %v1761_v22 }
 0xbd9   :  { %v1344_v4 = vmul.f32 -1.442695, %v899_v2  ;;  %v1343_v9 = vmul.f32 -1.442695, %v898_v6  ;;  %v1922_v2 = vld [vmem:[%s2050_s10] ss:$0 sm:$0xff] }
 0xbdb   :  { %1437 = vpow2.f32 %v1344_v4 }
 0xbdf   :  { %964 = vrot.lane.b32.xlu0 %v961_v63, %s1502_s19 }
 0xbe1   :  { %v1438_v5 = vpop.eup %1437 }
 0xbe2   :  { %v907_v7 = vadd.f32 1.0, %v1438_v5 }
 0xbe4   :  { %1439 = vrcp.f32 %v907_v7  ;;  %v934_v15 = vand.u32 2147483648, %v907_v7  ;;  %vm928_vm13 = vweird.f32 %v907_v7  ;;  %v932_v3 = vand.u32 2147483647, %v907_v7 }
 0xbe5   :  { %1441 = vpow2.f32 %v1343_v9 }
 0xbe6   :  { %v935_v17 = vor.u32 1.1754944e-38, %v934_v15  ;;  %vm933_vm15 = vcmp.eq.f32.partialorder %v932_v3, 8.507059e+37 }
 0xbe7   :  { %972 = vrot.lane.b32.xlu0 %v968_v23, %s1503_s20 }
 0xbea   :  { %v1440_v8 = vpop.eup %1439 }
 0xbeb   :  { %v924_v1 = vmul.f32 %v1440_v8, %v907_v7  ;;  %v1442_v11 = vpop.eup %1441  ;;  %vm929_vm12 = vweird.f32 %v1440_v8 }
 0xbec   :  { %v906_v13 = vadd.f32 1.0, %v1442_v11  ;;  %vm930_vm14 = vmor %vm928_vm13, %vm929_vm12 }
 0xbed   :  { %v925_v10 = vsub.f32 1.0, %v924_v1 }
 0xbee   :  { %1443 = vrcp.f32 %v906_v13  ;;  %v919_v33 = vand.u32 2147483648, %v906_v13  ;;  %vm913_vm3 = vweird.f32 %v906_v13  ;;  %v917_v34 = vand.u32 2147483647, %v906_v13 }
 0xbef   :  { %v926_v12 = vmul.f32 %v1440_v8, %v925_v10 }
 0xbf0   :  { %v920_v36 = vor.u32 1.1754944e-38, %v919_v33  ;;  %vm918_vm6 = vcmp.eq.f32.partialorder %v917_v34, 8.507059e+37 }
 0xbf1   :  { %v927_v14 = vadd.f32 %v1440_v8, %v926_v12 }
 0xbf3   :  { %v931_v16 = vsel %vm930_vm14, %v1440_v8, %v927_v14 }
 0xbf4   :  { %v936_v26 = vsel %vm933_vm15, %v935_v17, %v931_v16  ;;  %v1444_v28 = vpop.eup %1443 }
 0xbf5   :  { %v909_v30 = vmul.f32 %v1444_v28, %v906_v13  ;;  %vm914_vm2 = vweird.f32 %v1444_v28 }
 0xbf6   :  { %vm915_vm5 = vmor %vm913_vm3, %vm914_vm2 }
 0xbf7   :  { %v910_v29 = vsub.f32 1.0, %v909_v30 }
 0xbf9   :  { %v911_v31 = vmul.f32 %v1444_v28, %v910_v29 }
 0xbfb   :  { %v912_v32 = vadd.f32 %v1444_v28, %v911_v31 }
 0xbfd   :  { %v916_v35 = vsel %vm915_vm5, %v1444_v28, %v912_v32 }
 0xbfe   :  { %v921_v51 = vsel %vm918_vm6, %v920_v36, %v916_v35 }
 0xc31   :  { %v941_v20 = vpop.permute.xlu2 %940 }
 0xc32   :  { %v945_v27 = vmul.f32 %v941_v20, %v936_v26 }
 0xc34   :  { %950 = vrot.lane.b32.xlu1 %v945_v27, %s1503_s20 }
 0xc49   :  { %v939_v37 = vpop.permute.xlu0 %938 }
 0xc4a   :  { %v944_v38 = vmul.f32 %v939_v37, %v921_v51 }
 0xc4c   :  { %948 = vrot.lane.b32.xlu2 %v944_v38, %s1503_s20 }
 0xc51   :  { %v965_v39 = vpop.permute.xlu0 %964 }
 0xc52   :  { %v969_v42 = vmul.f32 %v965_v39, %v1777_v19 }
 0xc54   :  { %974 = vrot.lane.b32.xlu2 %v969_v42, %s1503_s20 }
 0xc59   :  { %v973_v54 = vpop.permute.xlu0 %972 }
 0xca6   :  { %v949_v43 = vpop.permute.xlu2 %948  ;;  %v951_v44 = vpop.permute.xlu1 %950 }
 0xca7   :  { %v954_v52 = vadd.f32 %v949_v43, %v1761_v22  ;;  %v955_v46 = vadd.f32 %v951_v44, %v1763_v25 }
 0xca9   :  { %1445 = vtanh.f32 %v954_v52 }
 0xcaa   :  { %1447 = vtanh.f32 %v955_v46 }
 0xcae   :  { %v975_v56 = vpop.permute.xlu2 %974 }
 0xcaf   :  { %v1446_v48 = vpop.eup %1445 }
 0xcb0   :  { %v1448_v49 = vpop.eup %1447  ;;  %v958_v53 = vmul.f32 %v1446_v48, %v1781_v21 }
 0xcb1   :  { %v959_v55 = vmul.f32 %v1448_v49, %v1774_v18 }
 0xcb2   :  { %v978_v57 = vadd.f32 %v973_v54, %v958_v53 }
 0xcb3   :  { %v979_v59 = vadd.f32 %v975_v56, %v959_v55 }
 0xcb4   :  { %v988_v60 = vrot.slane %v978_v57, 5  ;;  %v1084_v63 = vrot.slane %v978_v57, 7 }
 0xcb5   :  { %v989_v61 = vrot.slane %v979_v59, 4  ;;  %v1085_v6 = vrot.slane %v979_v59, 7 }
 0xcb7   :  { %v990_v62 = vsel %vm175_vm4, %v989_v61, %v988_v60 }
 0xcb8   :  { %991 = vrot.lane.b32.xlu1 %v990_v62, %s1502_s19 }
 0xcc0   :  { %1086 = vrot.lane.b32.xlu1 %v1084_v63, %s1502_s19 }
 0xd2a   :  { %v1915_v0 = vpop.permute.xlu1 %991 }
 0xd2b   :  { %1345 = vmatmul.msk.f32.vlgmr.msra.gmra.mxu3 %vm75_vm0, %v1915_v0 }
 0xd32   :  { %v1087_v8 = vpop.permute.xlu1 %1086 }
 0xd33   :  { %v1092_v9 = vmul.f32 %v1087_v8, %v1784_v24 }
 0xdae   :  { %v1014_v23 = vpop.f32.mrf.mxu3 }
 0xdaf   :  { %v1015_v4 = vadd.f32 %v1922_v2, %v1014_v23 }
 0xdb1   :  { %v1018_v5 = vrot.slane %v1015_v4, 2  ;;  %v1019_v7 = vrot.slane %v1015_v4, 3 }
 0xdb3   :  { %1064 = vrot.lane.b32.xlu2 %v1019_v7, %s1502_s19  ;;  %1062 = vrot.lane.b32.xlu0 %v1018_v5, %s1502_s19  ;;  %v1023_v1 = vadd.f32 %v1019_v7, %v1763_v25  ;;  %v1022_v13 = vadd.f32 %v1018_v5, %v1761_v22 }
 0xdb5   :  { %v1347_v10 = vmul.f32 -1.442695, %v1023_v1  ;;  %v1346_v15 = vmul.f32 -1.442695, %v1022_v13 }
 0xdb7   :  { %1449 = vpow2.f32 %v1347_v10 }
 0xdbb   :  { %1088 = vrot.lane.b32.xlu0 %v1085_v6, %s1502_s19 }
 0xdbd   :  { %v1450_v11 = vpop.eup %1449 }
 0xdbe   :  { %v1031_v12 = vadd.f32 1.0, %v1450_v11 }
 0xdc0   :  { %1451 = vrcp.f32 %v1031_v12  ;;  %v1058_v28 = vand.u32 2147483648, %v1031_v12  ;;  %vm1052_vm8 = vweird.f32 %v1031_v12  ;;  %v1056_v30 = vand.u32 2147483647, %v1031_v12 }
 0xdc1   :  { %1453 = vpow2.f32 %v1346_v15 }
 0xdc2   :  { %v1059_v31 = vor.u32 1.1754944e-38, %v1058_v28  ;;  %vm1057_vm10 = vcmp.eq.f32.partialorder %v1056_v30, 8.507059e+37 }
 0xdc3   :  { %1096 = vrot.lane.b32.xlu0 %v1092_v9, %s1503_s20 }
 0xdc6   :  { %v1452_v14 = vpop.eup %1451 }
 0xdc7   :  { %v1048_v3 = vmul.f32 %v1452_v14, %v1031_v12  ;;  %v1454_v17 = vpop.eup %1453  ;;  %vm1053_vm7 = vweird.f32 %v1452_v14 }
 0xdc8   :  { %v1030_v26 = vadd.f32 1.0, %v1454_v17  ;;  %vm1054_vm9 = vmor %vm1052_vm8, %vm1053_vm7 }
 0xdc9   :  { %v1049_v16 = vsub.f32 1.0, %v1048_v3 }
 0xdca   :  { %1455 = vrcp.f32 %v1030_v26  ;;  %v1043_v39 = vand.u32 2147483648, %v1030_v26  ;;  %vm1037_vm12 = vweird.f32 %v1030_v26  ;;  %v1041_v42 = vand.u32 2147483647, %v1030_v26 }
 0xdcb   :  { %v1050_v20 = vmul.f32 %v1452_v14, %v1049_v16 }
 0xdcc   :  { %v1044_v44 = vor.u32 1.1754944e-38, %v1043_v39  ;;  %vm1042_vm14 = vcmp.eq.f32.partialorder %v1041_v42, 8.507059e+37 }
 0xdcd   :  { %v1051_v27 = vadd.f32 %v1452_v14, %v1050_v20 }
 0xdcf   :  { %v1055_v29 = vsel %vm1054_vm9, %v1452_v14, %v1051_v27 }
 0xdd0   :  { %v1060_v33 = vsel %vm1057_vm10, %v1059_v31, %v1055_v29  ;;  %v1456_v35 = vpop.eup %1455 }
 0xdd1   :  { %v1033_v36 = vmul.f32 %v1456_v35, %v1030_v26  ;;  %vm1038_vm11 = vweird.f32 %v1456_v35  ;;  %v1474_v26 = vld [vmem:[%s2043_s3] sm:$0x3]  ;;  %s1313_s3 = sshll.u32 %s1506_s27, 4  ;;  %s1314_s3 = int_to_ptr.vmem [resolvable:$true] %s1313_s3 }
 0xdd2   :  { %vm1039_vm13 = vmor %vm1037_vm12, %vm1038_vm11  ;;  %v1957_v27 = vadd.s32 4294967295, %v1474_v26 }
 0xdd3   :  { %v1034_v37 = vsub.f32 1.0, %v1033_v36 }
 0xdd4   :  { %vm485_vm15 = vcmp.eq.s32.totalorder %v1957_v27, 1  ;;  %vm1104_vm5 = vcmp.eq.s32.totalorder %v1957_v27, 6  ;;  %vm364_vm8 = vcmp.eq.s32.totalorder %v1957_v27, 0  ;;  %vm732_vm9 = vcmp.eq.s32.totalorder %v1957_v27, 3 }
 0xdd5   :  { %v1035_v51 = vmul.f32 %v1456_v35, %v1034_v37 }
 0xdd7   :  { %v1036_v38 = vadd.f32 %v1456_v35, %v1035_v51 }
 0xdd9   :  { %v1040_v43 = vsel %vm1039_vm13, %v1456_v35, %v1036_v38  ;;  %v1105_v38 = vsel %vm1104_vm5, 1, %v1505_v47  ;;  %vm980_vm13 = vcmp.eq.s32.totalorder %v1957_v27, 5 }
 0xdda   :  { %v1045_v46 = vsel %vm1042_vm14, %v1044_v44, %v1040_v43 }
 0xe0d   :  { %v1065_v32 = vpop.permute.xlu2 %1064 }
 0xe0e   :  { %v1069_v34 = vmul.f32 %v1065_v32, %v1060_v33 }
 0xe10   :  { %1074 = vrot.lane.b32.xlu1 %v1069_v34, %s1503_s20 }
 0xe25   :  { %v1063_v52 = vpop.permute.xlu0 %1062 }
 0xe26   :  { %v1068_v48 = vmul.f32 %v1063_v52, %v1045_v46 }
 0xe28   :  { %1072 = vrot.lane.b32.xlu2 %v1068_v48, %s1503_s20 }
 0xe2d   :  { %v1089_v49 = vpop.permute.xlu0 %1088 }
 0xe2e   :  { %v1093_v53 = vmul.f32 %v1089_v49, %v1777_v19  ;;  %v365_v49 = vsel %vm364_vm8, 1, %v1505_v47 }
 0xe30   :  { %1098 = vrot.lane.b32.xlu2 %v1093_v53, %s1503_s20 }
 0xe35   :  { %v1097_v62 = vpop.permute.xlu0 %1096 }
 0xe82   :  { %v1073_v54 = vpop.permute.xlu2 %1072  ;;  %v1075_v55 = vpop.permute.xlu1 %1074 }
 0xe83   :  { %v1078_v56 = vadd.f32 %v1073_v54, %v1761_v22  ;;  %v1079_v57 = vadd.f32 %v1075_v55, %v1763_v25  ;;  %v733_v55 = vsel %vm732_vm9, 1, %v1505_v47 }
 0xe85   :  { %1457 = vtanh.f32 %v1078_v56 }
 0xe86   :  { %1459 = vtanh.f32 %v1079_v57 }
 0xe8a   :  { %v1099_v23 = vpop.permute.xlu2 %1098 }
 0xe8b   :  { %v1458_v59 = vpop.eup %1457 }
 0xe8c   :  { %v1460_v60 = vpop.eup %1459  ;;  %v1082_v61 = vmul.f32 %v1458_v59, %v1781_v21 }
 0xe8d   :  { %v1083_v63 = vmul.f32 %v1460_v60, %v1774_v18 }
 0xe8e   :  { %v1102_v4 = vadd.f32 %v1097_v62, %v1082_v61 }
 0xe8f   :  { %v1103_v5 = vadd.f32 %v1099_v23, %v1083_v63  ;;  %v981_v23 = vsel %vm980_vm13, 1, %v1505_v47 }
 0xe90   :  { %v1112_v7 = vrot.slane %v1102_v4, 6  ;;  %v1208_v9 = vrot.slane %v1102_v4, 7 }
 0xe91   :  { %v1113_v6 = vrot.slane %v1103_v5, 5  ;;  %v1209_v14 = vrot.slane %v1103_v5, 7 }
 0xe93   :  { %v1114_v8 = vsel %vm175_vm4, %v1113_v6, %v1112_v7 }
 0xe94   :  { %1115 = vrot.lane.b32.xlu1 %v1114_v8, %s1502_s19 }
 0xe9c   :  { %1210 = vrot.lane.b32.xlu1 %v1208_v9, %s1502_s19 }
 0xf06   :  { %v1943_v1 = vpop.permute.xlu1 %1115 }
 0xf07   :  { %1348 = vmatmul.msk.f32.vlgmr.msra.gmra.mxu1 %vm75_vm0, %v1943_v1 }
 0xf0e   :  { %v1211_v15 = vpop.permute.xlu1 %1210 }
 0xf0f   :  { %v1216_v3 = vmul.f32 %v1211_v15, %v1784_v24  ;;  %v486_v24 = vsel %vm485_vm15, 1, %v1505_v47  ;;  %vm608_vm15 = vcmp.eq.s32.totalorder %v1957_v27, 2 }
 0xf10   :  { %v609_v6 = vsel %vm608_vm15, 1, %v1505_v47 }
 0xf84   :  { %v1138_v10 = vpop.f32.mrf.mxu1 }
 0xf85   :  { %v1139_v11 = vadd.f32 %v1922_v2, %v1138_v10 }
 0xf87   :  { %v1142_v12 = vrot.slane %v1139_v11, 1  ;;  %v1143_v13 = vrot.slane %v1139_v11, 2 }
 0xf89   :  { %1188 = vrot.lane.b32.xlu2 %v1143_v13, %s1502_s19  ;;  %1186 = vrot.lane.b32.xlu0 %v1142_v12, %s1502_s19  ;;  %v1147_v16 = vadd.f32 %v1143_v13, %v1763_v25  ;;  %v1146_v28 = vadd.f32 %v1142_v12, %v1761_v22 }
 0xf8b   :  { %v1350_v17 = vmul.f32 -1.442695, %v1147_v16  ;;  %v1349_v29 = vmul.f32 -1.442695, %v1146_v28  ;;  %v1253_v28 = vld [vmem:[%s2052_s12 + $0x10] sm:$0xff] }
 0xf8d   :  { %1461 = vpow2.f32 %v1350_v17 }
 0xf91   :  { %1212 = vrot.lane.b32.xlu0 %v1209_v14, %s1502_s19 }
 0xf93   :  { %v1462_v20 = vpop.eup %1461 }
 0xf94   :  { %v1155_v2 = vadd.f32 1.0, %v1462_v20 }
 0xf96   :  { %1463 = vrcp.f32 %v1155_v2  ;;  %v1182_v37 = vand.u32 2147483648, %v1155_v2  ;;  %vm1176_vm3 = vweird.f32 %v1155_v2  ;;  %v1180_v51 = vand.u32 2147483647, %v1155_v2 }
 0xf97   :  { %1465 = vpow2.f32 %v1349_v29  ;;  %v1247_v29 = vld [vmem:[%s2051_s11 + $0x20] sm:$0xff] }
 0xf98   :  { %v1183_v42 = vor.u32 1.1754944e-38, %v1182_v37  ;;  %vm1181_vm7 = vcmp.eq.f32.partialorder %v1180_v51, 8.507059e+37 }
 0xf99   :  { %1220 = vrot.lane.b32.xlu0 %v1216_v3, %s1503_s20 }
 0xf9c   :  { %v1464_v30 = vpop.eup %1463 }
 0xf9d   :  { %v1172_v31 = vmul.f32 %v1464_v30, %v1155_v2  ;;  %v1466_v33 = vpop.eup %1465  ;;  %vm1177_vm2 = vweird.f32 %v1464_v30 }
 0xf9e   :  { %v1154_v35 = vadd.f32 1.0, %v1466_v33  ;;  %vm1178_vm6 = vmor %vm1176_vm3, %vm1177_vm2  ;;  %vm856_vm2 = vcmp.eq.s32.totalorder %v1957_v27, 4  ;;  %vm1228_vm3 = vcmp.eq.s32.totalorder %v1957_v27, 7  ;;  %v1244_v33 = vld [vmem:[%s2051_s11 + $0x8] sm:$0xff] }
 0xf9f   :  { %v1173_v32 = vsub.f32 1.0, %v1172_v31  ;;  %v857_v8 = vsel %vm856_vm2, 1, %v1505_v47  ;;  %v1229_v9 = vsel %vm1228_vm3, 1, %v1505_v47  ;;  %v1246_v31 = vld [vmem:[%s2051_s11 + $0x18] sm:$0xff] }
 0xfa0   :  { %1467 = vrcp.f32 %v1154_v35  ;;  %v1167_v57 = vand.u32 2147483648, %v1154_v35  ;;  %vm1161_vm11 = vweird.f32 %v1154_v35  ;;  %v1165_v59 = vand.u32 2147483647, %v1154_v35 }
 0xfa1   :  { %488 = vperm.xlu0 %1362, %v486_v24   ;;  %v1174_v34 = vmul.f32 %v1464_v30, %v1173_v32  ;;  %v1251_v24 = vld [vmem:[%s2052_s12] sm:$0xff]  ;;  %v1245_v32 = vld [vmem:[%s2051_s11 + $0x10] sm:$0xff] }
 0xfa2   :  { %v1168_v61 = vor.u32 1.1754944e-38, %v1167_v57  ;;  %vm1166_vm14 = vcmp.eq.f32.partialorder %v1165_v59, 8.507059e+37 }
 0xfa3   :  { %v1175_v36 = vadd.f32 %v1464_v30, %v1174_v34  ;;  %v1243_v34 = vld [vmem:[%s2051_s11] sm:$0xff] }
 0xfa5   :  { %v1179_v39 = vsel %vm1178_vm6, %v1464_v30, %v1175_v36  ;;  %v1252_v30 = vld [vmem:[%s2052_s12 + $0x8] sm:$0xff] }
 0xfa6   :  { %v1184_v44 = vsel %vm1181_vm7, %v1183_v42, %v1179_v39  ;;  %v1468_v46 = vpop.eup %1467 }
 0xfa7   :  { %v1157_v48 = vmul.f32 %v1468_v46, %v1154_v35  ;;  %vm1162_vm10 = vweird.f32 %v1468_v46  ;;  %v1475_v35 = vld [vmem:[%s2041_s1] sm:$0x3] }
 0xfa8   :  { %vm1163_vm12 = vmor %vm1161_vm11, %vm1162_vm10  ;;  %vm1306_vm11 = vcmask 254976  }
 0xfa9   :  { %1107 = vperm.xlu0 %1362, %v1105_v38   ;;  %v1158_v53 = vsub.f32 1.0, %v1157_v48 }
 0xfab   :  { %v1159_v54 = vmul.f32 %v1468_v46, %v1158_v53 }
 0xfad   :  { %v1160_v56 = vadd.f32 %v1468_v46, %v1159_v54 }
 0xfaf   :  { %v1164_v60 = vsel %vm1163_vm12, %v1468_v46, %v1160_v56 }
 0xfb0   :  { %v1169_v63 = vsel %vm1166_vm14, %v1168_v61, %v1164_v60 }
 0xfe3   :  { %v1189_v43 = vpop.permute.xlu2 %1188 }
 0xfe4   :  { %v1193_v52 = vmul.f32 %v1189_v43, %v1184_v44 }
 0xfe6   :  { %1198 = vrot.lane.b32.xlu1 %v1193_v52, %s1503_s20 }
 0xfee   :  { %367 = vperm.xlu1 %1361, %v365_v49  }
 0xff6   :  { %735 = vperm.xlu1 %1361, %v733_v55  }
 0xffb   :  { %v1187_v62 = vpop.permute.xlu0 %1186 }
 0xffc   :  { %v1192_v4 = vmul.f32 %v1187_v62, %v1169_v63 }
 0xffe   :  { %1196 = vrot.lane.b32.xlu2 %v1192_v4, %s1503_s20  ;;  %983 = vperm.xlu1 %1361, %v981_v23  }
0x1003   :  { %v1213_v5 = vpop.permute.xlu0 %1212 }
0x1004   :  { %v1217_v7 = vmul.f32 %v1213_v5, %v1777_v19 }
0x1006   :  { %1222 = vrot.lane.b32.xlu2 %v1217_v7, %s1503_s20 }
0x100b   :  { %v1221_v3 = vpop.permute.xlu0 %1220 }
0x100e   :  { %611 = vperm.xlu2 %1363, %v609_v6  }
0x1013   :  { %v489_v38 = vpop.permute.xlu0 %488 }
0x1014   :  { %vm490_vm5 = vcmp.eq.s32.totalorder %v489_v38, 1 }
0x1016   :  { %859 = vperm.xlu2 %1363, %v857_v8  }
0x101b   :  { %v1108_v49 = vpop.permute.xlu0 %1107 }
0x101c   :  { %vm1109_vm9 = vcmp.eq.s32.totalorder %v1108_v49, 1 }
0x101e   :  { %1231 = vperm.xlu2 %1363, %v1229_v9  }
0x1058   :  { %v1197_v10 = vpop.permute.xlu2 %1196  ;;  %v1199_v11 = vpop.permute.xlu1 %1198 }
0x1059   :  { %v1202_v19 = vadd.f32 %v1197_v10, %v1761_v22  ;;  %v1203_v12 = vadd.f32 %v1199_v11, %v1763_v25  ;;  %v1250_v22 = vld [vmem:[%s2051_s11 + $0x38] sm:$0xff]  ;;  %v1249_v25 = vld [vmem:[%s2051_s11 + $0x30] sm:$0xff] }
0x105a   :  { %1288 = vmatpush.msrb.mxu3 %v1250_v22 }
0x105b   :  { %1469 = vtanh.f32 %v1202_v19 }
0x105c   :  { %1471 = vtanh.f32 %v1203_v12  ;;  %1289 = vmatpush.msrb.mxu3 %v1249_v25 }
0x1060   :  { %v1223_v17 = vpop.permute.xlu2 %1222  ;;  %v368_v36 = vpop.permute.xlu1 %367 }
0x1061   :  { %v1470_v13 = vpop.eup %1469 }
0x1062   :  { %v1472_v14 = vpop.eup %1471  ;;  %v1206_v15 = vmul.f32 %v1470_v13, %v1781_v21  ;;  %v1248_v21 = vld [vmem:[%s2051_s11 + $0x28] sm:$0xff] }
0x1063   :  { %v1207_v16 = vmul.f32 %v1472_v14, %v1774_v18  ;;  %v1254_v18 = vld [vmem:[%s2052_s12 + $0x18] sm:$0xff]  ;;  %1290 = vmatpush.msrb.mxu3 %v1248_v21 }
0x1064   :  { %v1226_v20 = vadd.f32 %v1221_v3, %v1206_v15  ;;  %1270 = vmatpush.msrb.mxu2 %v1254_v18 }
0x1065   :  { %v1227_v2 = vadd.f32 %v1223_v17, %v1207_v16  ;;  %1291 = vmatpush.msrb.mxu3 %v1247_v29 }
0x1066   :  { %v1236_v47 = vrot.slane %v1226_v20, 7  ;;  %1271 = vmatpush.msrb.mxu2 %v1253_v28 }
0x1067   :  { %v1237_v26 = vrot.slane %v1227_v2, 6  ;;  %1292 = vmatpush.msrb.mxu3 %v1246_v31 }
0x1068   :  { %1272 = vmatpush.msrb.mxu2 %v1252_v30  ;;  %v612_v37 = vpop.permute.xlu2 %611  ;;  %v736_v51 = vpop.permute.xlu1 %735 }
0x1069   :  { %v1238_v27 = vsel %vm175_vm4, %v1237_v26, %v1236_v47  ;;  %1293 = vmatpush.msrb.mxu3 %v1245_v32  ;;  %vm369_vm4 = vcmp.eq.s32.totalorder %v368_v36, 1  ;;  %vm613_vm6 = vcmp.eq.s32.totalorder %v612_v37, 1  ;;  %vm737_vm7 = vcmp.eq.s32.totalorder %v736_v51, 1 }
0x106a   :  { %1239 = vrot.lane.b32.xlu1 %v1238_v27, %s1502_s19  ;;  %1273 = vmatpush.msrb.mxu2 %v1251_v24  ;;  %v377_v39 = vsel %vm369_vm4, %v1796_v41, 0.0 }
0x106b   :  { %1294 = vmatpush.msrb.mxu3 %v1244_v33  ;;  %v498_v43 = vsel %vm490_vm5, %v1823_v40, %v377_v39 }
0x106c   :  { %v622_v44 = vsel %vm613_vm6, %v1846_v45, %v498_v43 }
0x106d   :  { %1295 = vmatpush.msrb.mxu3 %v1243_v34  ;;  %v746_v46 = vsel %vm737_vm7, %v1869_v50, %v622_v44  ;;  %v1368_v50 = vld [vmem:[%s2053_s13] ss:$0 sm:$0xff] }
0x106e   :  { %1352 = vmatmul.msk.f32.vlgmr.msrb.gmra.mxu3 %vm78_vm1, %v1475_v35 }
0x1070   :  { %v860_v42 = vpop.permute.xlu2 %859  ;;  %v984_v52 = vpop.permute.xlu1 %983 }
0x1071   :  { %vm861_vm8 = vcmp.eq.s32.totalorder %v860_v42, 1  ;;  %vm985_vm1 = vcmp.eq.s32.totalorder %v984_v52, 1 }
0x1072   :  { %v870_v48 = vsel %vm861_vm8, %v1892_v58, %v746_v46 }
0x1073   :  { %v994_v53 = vsel %vm985_vm1, %v1915_v0, %v870_v48 }
0x1074   :  { %v1118_v54 = vsel %vm1109_vm9, %v1943_v1, %v994_v53 }
0x1078   :  { %v1232_v41 = vpop.permute.xlu2 %1231 }
0x1079   :  { %vm1233_vm10 = vcmp.eq.s32.totalorder %v1232_v41, 1 }
0x10dc   :  { %v1240_v55 = vpop.permute.xlu1 %1239 }
0x10dd   :  { %v1242_v40 = vsel %vm1233_vm10, %v1240_v55, %v1118_v54 }
0x10de   :  { %1351 = vmatmul.msk.f32.vlgmr.msrb.gmra.mxu2 %vm75_vm0, %v1242_v40 }
0x10f1   :  { %v1297_v45 = vpop.f32.mrf.mxu3 }
0x1161   :  { %v1275_v56 = vpop.f32.mrf.mxu2 }
0x1162   :  { %v1298_v58 = vadd.f32 %v1297_v45, %v1275_v56 }
0x1164   :  { %v1304_v0 = vadd.f32 %v1368_v50, %v1298_v58 }
0x1166   :  { %v1305_v1 = vmax.f32 %v1304_v0, 0.0 }
0x1168   :  { %1307 = vst.msk [vmem:[#allocation3] sm:$0x3] %vm1306_vm11, %v1305_v1 }
0x1169   :  { %1318 = dma.vmem_to_hbm [thread:$0]  %s1314_s3, 32, %s1316_s2, [#allocation4]  }
0x116a   :  { %1500 = dma.done.wait [#allocation4], 32  }
0x116b   :  { %1501 = vsyncadd [#allocation4], 4294967264 }
0x116c   :  { %1323 = vsyncpa [#allocation4], 1 }

</bundles_post_ra>
